<compile_context>
chip_gen: v7x
topology: tpu7x:2x2x1
jax: 0.10.0
libtpu: 0.0.40
codegen_flags: <defaults>
</compile_context>

<pallas_src>
import math
import functools

import jax
import jax.numpy as jnp
from jax.experimental import pallas as pl
from jax.experimental.pallas import tpu as pltpu


def _chip_budgets():
    """Generation-aware budgets: v5e/v6e have 128 MiB physical VMEM, v7x 64 MiB."""
    cap = None
    try:
        cap = getattr(pltpu.get_tpu_info(), "vmem_capacity_bytes", None)
    except Exception:
        cap = None
    if cap is not None and cap >= 100 * 1024 * 1024:          # v5e / v6e
        return 96 * 1024 * 1024, 24 * 1024 * 1024
    return 40 * 1024 * 1024, 8 * 1024 * 1024                  # v7x / unknown: conservative


_VMEM_LIMIT, _FUSED_WEIGHT_BUDGET = _chip_budgets()
# EUP reciprocal for the softmax denominator (~1e-3 rel err). Set False for exact division.
_APPROX_SOFTMAX_RECIP = True


def _tile(dim, target, align):
    """Largest divisor of `dim` that is <= target and a multiple of `align`;
    falls back to the full dimension (full-extent blocks are always legal)."""
    if dim <= target:
        return dim
    t = (target // align) * align
    while t >= align:
        if dim % t == 0:
            return t
        t -= align
    return dim


def _tile_and_pad(dim, target, align):
    """Return (tile, padded_dim). When no aligned divisor <= target exists, pad the
    dimension to the next tile multiple instead of emitting a huge full-extent block."""
    if dim <= target:
        return dim, dim
    t_max = max(align, (target // align) * align)
    t = t_max
    while t >= align:
        if dim % t == 0:
            return t, dim
        t -= align
    padded = ((dim + t_max - 1) // t_max) * t_max
    return t_max, padded


def _row_tile(M, target=512):
    """Row tile for fused elementwise/LN kernels; keep >= 2 row blocks when possible
    so v7x's 2 TensorCores both get work on the 'parallel' axis."""
    if M >= 16:
        target = min(target, max(8, (M // 2 // 8) * 8))
    return _tile(M, target, 8)


# ----------------------------------------------------------------------------
# Tiled linear (with / without bias, optional ReLU) — bf16 MXU, f32 accumulation
# ----------------------------------------------------------------------------

def _matmul_bias_kernel(x_ref, w_ref, b_ref, o_ref, acc_ref, *, relu):
    @pl.when(pl.program_id(2) == 0)
    def _():
        acc_ref[...] = jnp.zeros_like(acc_ref)

    acc_ref[...] += jnp.dot(x_ref[...].astype(jnp.bfloat16),
                            w_ref[...].astype(jnp.bfloat16),
                            preferred_element_type=jnp.float32)

    @pl.when(pl.program_id(2) == pl.num_programs(2) - 1)
    def _():
        y = acc_ref[...] + b_ref[...]
        if relu:
            y = jnp.maximum(y, 0.0)
        o_ref[...] = y.astype(o_ref.dtype)


def _matmul_kernel(x_ref, w_ref, o_ref, acc_ref, *, relu):
    @pl.when(pl.program_id(2) == 0)
    def _():
        acc_ref[...] = jnp.zeros_like(acc_ref)

    acc_ref[...] += jnp.dot(x_ref[...].astype(jnp.bfloat16),
                            w_ref[...].astype(jnp.bfloat16),
                            preferred_element_type=jnp.float32)

    @pl.when(pl.program_id(2) == pl.num_programs(2) - 1)
    def _():
        y = acc_ref[...]
        if relu:
            y = jnp.maximum(y, 0.0)
        o_ref[...] = y.astype(o_ref.dtype)


def pallas_linear(x, w, b=None, relu=False, tm=512, tn=256, tk=1024):
    """x: (M, K) f32, w: (K, N) bf16/f32, b: (N,) f32 or None -> (M, N) f32."""
    M, K = x.shape
    N = w.shape[1]
    tm, Mp = _tile_and_pad(M, tm, 8)
    tn, Np = _tile_and_pad(N, tn, 128)
    tk, Kp = _tile_and_pad(K, tk, 128)

    # Zero-padding is exact for a matmul (padded K contributes 0; padded M/N sliced off).
    if Mp != M or Kp != K:
        x = jnp.pad(x, ((0, Mp - M), (0, Kp - K)))
    if Kp != K or Np != N:
        w = jnp.pad(w, ((0, Kp - K), (0, Np - N)))
    if b is not None and Np != N:
        b = jnp.pad(b, (0, Np - N))

    grid = (Mp // tm, Np // tn, Kp // tk)

    in_specs = [pl.BlockSpec((tm, tk), lambda i, j, k: (i, k)),
                pl.BlockSpec((tk, tn), lambda i, j, k: (k, j))]
    args = [x, w]
    if b is not None:
        in_specs.append(pl.BlockSpec((1, tn), lambda i, j, k: (0, j)))
        args.append(b.reshape(1, Np))
        kern = functools.partial(_matmul_bias_kernel, relu=relu)
    else:
        kern = functools.partial(_matmul_kernel, relu=relu)

    w_bytes = w.dtype.itemsize
    out = pl.pallas_call(
        kern,
        out_shape=jax.ShapeDtypeStruct((Mp, Np), jnp.float32),
        grid=grid,
        in_specs=in_specs,
        out_specs=pl.BlockSpec((tm, tn), lambda i, j, k: (i, j)),
        scratch_shapes=[pltpu.VMEM((tm, tn), jnp.float32)],
        compiler_params=pltpu.CompilerParams(
            dimension_semantics=("parallel", "parallel", "arbitrary"),
            vmem_limit_bytes=_VMEM_LIMIT),
        cost_estimate=pl.CostEstimate(
            flops=2 * M * N * K,
            transcendentals=0,
            bytes_accessed=4 * (M * K + M * N) + w_bytes * K * N),
    )(*args)

    if Mp != M or Np != N:
        out = out[:M, :N]
    return out


# ----------------------------------------------------------------------------
# Multi-head attention: grid over batch only, heads split inside the kernel.
# The 1/sqrt(dh) scale is folded into the Q projection weights at init time.
# ----------------------------------------------------------------------------

def _attend_heads(q_of, k_of, v_of, bias, o_ref, nh, dh):
    """Per-head attention; each head's context is stored directly into its lane-range
    of the output ref (no concatenate, flat vreg pressure)."""
    for h in range(nh):                                   # nh is a small static constant
        qh = q_of(h)                                      # (Sq, dh) bf16 (scale pre-folded)
        kh = k_of(h)                                      # (Sk, dh) bf16
        vh = v_of(h)                                      # (Sk, dh) bf16
        s = jax.lax.dot_general(qh, kh, (((1,), (1,)), ((), ())),
                                preferred_element_type=jnp.float32)
        s = s + bias
        s = s - jnp.max(s, axis=-1, keepdims=True)
        p = jnp.exp(s)
        denom = jnp.sum(p, axis=-1, keepdims=True)
        if _APPROX_SOFTMAX_RECIP:
            p = p * pl.reciprocal(denom, approx=True)
        else:
            p = p / denom
        o_ref[:, h * dh:(h + 1) * dh] = jnp.dot(
            p.astype(jnp.bfloat16), vh, preferred_element_type=jnp.float32)


def _self_attn_kernel(qkv_ref, m_ref, o_ref, *, nh, dh, H):
    # additive mask formed once from the int8 {0,1} mask, shared by all heads
    bias = (1.0 - m_ref[...].astype(jnp.float32)) * -10000.0      # (Sq, Sk)
    _attend_heads(
        lambda h: qkv_ref[:, h * dh:(h + 1) * dh].astype(jnp.bfloat16),
        lambda h: qkv_ref[:, H + h * dh:H + (h + 1) * dh].astype(jnp.bfloat16),
        lambda h: qkv_ref[:, 2 * H + h * dh:2 * H + (h + 1) * dh].astype(jnp.bfloat16),
        bias, o_ref, nh, dh)


def _cross_attn_kernel(q_ref, kv_ref, m_ref, o_ref, *, nh, dh, H):
    bias = (1.0 - m_ref[...].astype(jnp.float32)) * -10000.0      # (Sq, Sk)
    _attend_heads(
        lambda h: q_ref[:, h * dh:(h + 1) * dh].astype(jnp.bfloat16),
        lambda h: kv_ref[:, h * dh:(h + 1) * dh].astype(jnp.bfloat16),
        lambda h: kv_ref[:, H + h * dh:H + (h + 1) * dh].astype(jnp.bfloat16),
        bias, o_ref, nh, dh)


def _attn_cost(B, Sq, Sk, H, nh, extra_in_bytes):
    return pl.CostEstimate(
        flops=4 * B * Sq * Sk * H,
        transcendentals=B * nh * Sq * Sk,
        bytes_accessed=extra_in_bytes + B * Sq * Sk + 4 * B * Sq * H)


def pallas_self_attention(qkv, mask_i8, nh):
    """qkv: (B, S, 3H) f32 fused projection, mask_i8: (B, S, S) int8 {0,1} -> (B, S, H)."""
    B, Sq, H3 = qkv.shape
    H = H3 // 3
    dh = H // nh
    kern = functools.partial(_self_attn_kernel, nh=nh, dh=dh, H=H)
    # TODO(synk): for long sequences a flash-style KV-tiled (online-softmax) variant
    # is needed — the whole-per-batch design hits the v7x 64 MiB VMEM cliff first.
    return pl.pallas_call(
        kern,
        out_shape=jax.ShapeDtypeStruct((B, Sq, H), jnp.float32),
        grid=(B,),
        in_specs=[pl.BlockSpec((None, Sq, H3), lambda b: (b, 0, 0)),
                  pl.BlockSpec((None, Sq, Sq), lambda b: (b, 0, 0))],
        out_specs=pl.BlockSpec((None, Sq, H), lambda b: (b, 0, 0)),
        compiler_params=pltpu.CompilerParams(
            dimension_semantics=("parallel",),
            vmem_limit_bytes=_VMEM_LIMIT),
        cost_estimate=_attn_cost(B, Sq, Sq, H, nh, 4 * B * Sq * H3),
    )(qkv, mask_i8)


def pallas_cross_attention(q, kv, mask_i8, nh):
    """q: (B, Sq, H) f32, kv: (B, Sk, 2H) f32 fused, mask_i8: (B, Sq, Sk) int8 -> (B, Sq, H)."""
    B, Sq, H = q.shape
    Sk = kv.shape[1]
    dh = H // nh
    kern = functools.partial(_cross_attn_kernel, nh=nh, dh=dh, H=H)
    return pl.pallas_call(
        kern,
        out_shape=jax.ShapeDtypeStruct((B, Sq, H), jnp.float32),
        grid=(B,),
        in_specs=[pl.BlockSpec((None, Sq, H), lambda b: (b, 0, 0)),
                  pl.BlockSpec((None, Sk, 2 * H), lambda b: (b, 0, 0)),
                  pl.BlockSpec((None, Sq, Sk), lambda b: (b, 0, 0))],
        out_specs=pl.BlockSpec((None, Sq, H), lambda b: (b, 0, 0)),
        compiler_params=pltpu.CompilerParams(
            dimension_semantics=("parallel",),
            vmem_limit_bytes=_VMEM_LIMIT),
        cost_estimate=_attn_cost(B, Sq, Sk, H, nh, 4 * B * (Sq * H + Sk * 2 * H)),
    )(q, kv, mask_i8)


# ----------------------------------------------------------------------------
# Fused (dense + residual-add + LayerNorm) and (FFN + residual-add + LayerNorm)
# ----------------------------------------------------------------------------

def _layernorm(x, g, b, eps):
    u = jnp.mean(x, axis=-1, keepdims=True)
    s = jnp.mean((x - u) ** 2, axis=-1, keepdims=True)
    return g * ((x - u) * jax.lax.rsqrt(s + eps)) + b


def _add_ln_kernel(x_ref, r_ref, g_ref, b_ref, o_ref, *, eps):
    o_ref[...] = _layernorm(x_ref[...] + r_ref[...], g_ref[...], b_ref[...], eps)


def pallas_add_layernorm(x, res, gamma, beta, eps=1e-12):
    """LayerNorm(x + res) over last dim; row-tiled, parallel grid."""
    M, E = x.shape
    tm = _row_tile(M)
    kern = functools.partial(_add_ln_kernel, eps=eps)
    return pl.pallas_call(
        kern,
        out_shape=jax.ShapeDtypeStruct((M, E), jnp.float32),
        grid=(M // tm,),
        in_specs=[pl.BlockSpec((tm, E), lambda i: (i, 0)),
                  pl.BlockSpec((tm, E), lambda i: (i, 0)),
                  pl.BlockSpec((1, E), lambda i: (0, 0)),
                  pl.BlockSpec((1, E), lambda i: (0, 0))],
        out_specs=pl.BlockSpec((tm, E), lambda i: (i, 0)),
        compiler_params=pltpu.CompilerParams(
            dimension_semantics=("parallel",),
            vmem_limit_bytes=_VMEM_LIMIT),
        cost_estimate=pl.CostEstimate(
            flops=8 * M * E, transcendentals=M, bytes_accessed=12 * M * E),
    )(x, res, gamma.reshape(1, E), beta.reshape(1, E))


def _dense_add_ln_kernel(x_ref, w_ref, b_ref, r_ref, g_ref, bt_ref, o_ref, *, eps):
    y = jnp.dot(x_ref[...].astype(jnp.bfloat16), w_ref[...],
                preferred_element_type=jnp.float32) + b_ref[...]
    y = y + r_ref[...]
    o_ref[...] = _layernorm(y, g_ref[...], bt_ref[...], eps)


def _weight_bytes(*ws):
    return sum(w.size * w.dtype.itemsize for w in ws)


def dense_add_layernorm(x, w, b, res, gamma, beta, eps=1e-12):
    """LayerNorm(x @ w + b + res): fused when the weight fits VMEM, else tiled+unfused."""
    M, K = x.shape
    N = w.shape[1]
    # TODO(synk): constant-index weight blocks are still double-buffered by the pipeliner;
    # pipeline_mode=pl.Buffered(1) would halve their resident footprint.
    if 2 * _weight_bytes(w) > _FUSED_WEIGHT_BUDGET:
        y = pallas_linear(x, w, b)
        return pallas_add_layernorm(y, res, gamma, beta, eps)
    tm = _row_tile(M, 256)
    kern = functools.partial(_dense_add_ln_kernel, eps=eps)
    return pl.pallas_call(
        kern,
        out_shape=jax.ShapeDtypeStruct((M, N), jnp.float32),
        grid=(M // tm,),
        in_specs=[pl.BlockSpec((tm, K), lambda i: (i, 0)),
                  pl.BlockSpec((K, N), lambda i: (0, 0)),
                  pl.BlockSpec((1, N), lambda i: (0, 0)),
                  pl.BlockSpec((tm, N), lambda i: (i, 0)),
                  pl.BlockSpec((1, N), lambda i: (0, 0)),
                  pl.BlockSpec((1, N), lambda i: (0, 0))],
        out_specs=pl.BlockSpec((tm, N), lambda i: (i, 0)),
        compiler_params=pltpu.CompilerParams(
            dimension_semantics=("parallel",),
            vmem_limit_bytes=_VMEM_LIMIT),
        cost_estimate=pl.CostEstimate(
            flops=2 * M * K * N + 10 * M * N, transcendentals=M,
            bytes_accessed=4 * (M * K + 2 * M * N) + _weight_bytes(w)),
    )(x, w, b.reshape(1, N), res, gamma.reshape(1, N), beta.reshape(1, N))


def _ffn_add_ln_kernel(h_ref, w1_ref, b1_ref, w2_ref, b2_ref, g_ref, bt_ref, o_ref, *, eps):
    h = h_ref[...]
    y = jnp.maximum(jnp.dot(h.astype(jnp.bfloat16), w1_ref[...],
                            preferred_element_type=jnp.float32) + b1_ref[...], 0.0)
    z = jnp.dot(y.astype(jnp.bfloat16), w2_ref[...],
                preferred_element_type=jnp.float32) + b2_ref[...] + h
    o_ref[...] = _layernorm(z, g_ref[...], bt_ref[...], eps)


def ffn_add_layernorm(h, w1, b1, w2, b2, gamma, beta, eps=1e-12):
    """LayerNorm(relu(h@w1+b1)@w2+b2 + h): fused when both weights fit VMEM."""
    M, E = h.shape
    I = w1.shape[1]
    tm = _row_tile(M, 256)
    if 2 * _weight_bytes(w1, w2) + 4 * tm * I > _FUSED_WEIGHT_BUDGET:
        y = pallas_linear(h, w1, b1, relu=True)
        z = pallas_linear(y, w2, b2)
        return pallas_add_layernorm(z, h, gamma, beta, eps)
    kern = functools.partial(_ffn_add_ln_kernel, eps=eps)
    return pl.pallas_call(
        kern,
        out_shape=jax.ShapeDtypeStruct((M, E), jnp.float32),
        grid=(M // tm,),
        in_specs=[pl.BlockSpec((tm, E), lambda i: (i, 0)),
                  pl.BlockSpec((E, I), lambda i: (0, 0)),
                  pl.BlockSpec((1, I), lambda i: (0, 0)),
                  pl.BlockSpec((I, E), lambda i: (0, 0)),
                  pl.BlockSpec((1, E), lambda i: (0, 0)),
                  pl.BlockSpec((1, E), lambda i: (0, 0)),
                  pl.BlockSpec((1, E), lambda i: (0, 0))],
        out_specs=pl.BlockSpec((tm, E), lambda i: (i, 0)),
        compiler_params=pltpu.CompilerParams(
            dimension_semantics=("parallel",),
            vmem_limit_bytes=_VMEM_LIMIT),
        cost_estimate=pl.CostEstimate(
            flops=4 * M * E * I + 10 * M * E, transcendentals=M,
            bytes_accessed=8 * M * E + _weight_bytes(w1, w2)),
    )(h, w1, b1.reshape(1, I), w2, b2.reshape(1, E),
      gamma.reshape(1, E), beta.reshape(1, E))


# ----------------------------------------------------------------------------
# Plain-JAX glue (embedding lookup, positional encoding)
# ----------------------------------------------------------------------------

def get_position_embedding(B, S, E):
    pos = jnp.arange(1, S + 1, dtype=jnp.float32)[:, None]                 # (S, 1)
    bins = (2.0 * jnp.arange(E // 2, dtype=jnp.float32))[None, :]          # (1, E/2)
    evens = pos @ (1.0 / jnp.power(10000.0, bins / float(E)))              # (S, E/2)
    pe = jnp.stack([jnp.sin(evens), jnp.cos(evens)], axis=2).reshape(S, E)
    return jnp.broadcast_to(pe, (B, S, E))


def embeddings(word_emb, ids):
    # TODO(synk): dropout is treated as identity (eval-mode semantics).
    B, S = ids.shape
    E = word_emb.shape[1]
    return word_emb[ids] + get_position_embedding(B, S, E)


# ----------------------------------------------------------------------------
# Transformer layers
# ----------------------------------------------------------------------------

def self_attention_block(p, x, mask_i8, nh):
    B, S, E = x.shape
    H3 = p["qkv"]["w"].shape[1]
    qkv = pallas_linear(x.reshape(B * S, E), p["qkv"]["w"], p["qkv"]["b"]).reshape(B, S, H3)
    return pallas_self_attention(qkv, mask_i8, nh)          # fused qkv, no HBM slices


def cross_attention_block(p, x, enc, mask_i8, nh):
    B, Sq, E = x.shape
    Sk = enc.shape[1]
    H = p["q"]["w"].shape[1]
    q = pallas_linear(x.reshape(B * Sq, E), p["q"]["w"], p["q"]["b"]).reshape(B, Sq, H)
    kv = pallas_linear(enc.reshape(B * Sk, E), p["kv"]["w"], p["kv"]["b"]).reshape(B, Sk, 2 * H)
    return pallas_cross_attention(q, kv, mask_i8, nh)        # fused kv, no HBM slices


def encoder_layer(p, h, attn_mask_i8, nh):
    B, S, E = h.shape
    ctx = self_attention_block(p["attn"], h, attn_mask_i8, nh)       # (B, S, H)
    h1 = dense_add_layernorm(ctx.reshape(B * S, ctx.shape[-1]),
                             p["addnorm_dense"]["w"], p["addnorm_dense"]["b"],
                             h.reshape(B * S, E),
                             p["addnorm_ln"]["gamma"], p["addnorm_ln"]["beta"])
    out = ffn_add_layernorm(h1, p["ffn1"]["w"], p["ffn1"]["b"],
                            p["ffn2"]["w"], p["ffn2"]["b"],
                            p["ln"]["gamma"], p["ln"]["beta"])
    return out.reshape(B, S, E)


def decoder_layer(p, h, enc_out, out_mask_i8, mut_mask_i8, nh):
    B, S, E = h.shape
    # self attention + add&norm
    ctx = self_attention_block(p["self_attn"], h, out_mask_i8, nh)
    h1 = dense_add_layernorm(ctx.reshape(B * S, ctx.shape[-1]),
                             p["self_dense"]["w"], p["self_dense"]["b"],
                             h.reshape(B * S, E),
                             p["self_ln"]["gamma"], p["self_ln"]["beta"])
    h1 = h1.reshape(B, S, E)
    # mutual (cross) attention + add&norm
    ctx = cross_attention_block(p["mut_attn"], h1, enc_out, mut_mask_i8, nh)
    h2 = dense_add_layernorm(ctx.reshape(B * S, ctx.shape[-1]),
                             p["mut_dense"]["w"], p["mut_dense"]["b"],
                             h1.reshape(B * S, E),
                             p["mut_ln"]["gamma"], p["mut_ln"]["beta"])
    # FFN + add&norm
    out = ffn_add_layernorm(h2, p["ffn1"]["w"], p["ffn1"]["b"],
                            p["ffn2"]["w"], p["ffn2"]["b"],
                            p["ln"]["gamma"], p["ln"]["beta"])
    return out.reshape(B, S, E)


def forward_transformer(params, input_ids, output_ids,
                        input_mask, output_mask, mutual_mask, nh):
    # masks are {0,1}; carry them as int8 (4x less attention-mask DMA), the additive
    # (1-m)*-10000 bias is formed inside the attention kernels.
    in_m = input_mask.astype(jnp.int8)
    out_m = output_mask.astype(jnp.int8)
    mut_m = mutual_mask.astype(jnp.int8)

    in_emb = embeddings(params["word_emb"], input_ids)
    out_emb = embeddings(params["word_emb"], output_ids)

    enc = in_emb
    for lp in params["encoder"]:
        enc = encoder_layer(lp, enc, in_m, nh)

    dec = out_emb
    for lp in params["decoder"]:
        dec = decoder_layer(lp, dec, enc, out_m, mut_m, nh)

    B, S, E = dec.shape
    V = params["predict_w"].shape[1]
    logits = pallas_linear(dec.reshape(B * S, E), params["predict_w"])  # no bias
    return logits.reshape(B, S, V)


# ----------------------------------------------------------------------------
# Deterministic parameter initialization:
#   * QKV / KV projections pre-fused,
#   * 1/sqrt(dh) folded into the Q columns (weight AND bias),
#   * matmul weights stored bf16 (half the weight DMA, MXU-native).
# ----------------------------------------------------------------------------

def _init_linear(key, fan_in, fan_out):
    kw, kb = jax.random.split(key)
    return {"w": jax.random.normal(kw, (fan_in, fan_out), jnp.float32) * 0.02,
            "b": jax.random.normal(kb, (fan_out,), jnp.float32) * 0.02}


def _fold_q_scale(lin, n_q_cols, scale):
    """Fold the attention 1/sqrt(dh) scale into the first n_q_cols output columns."""
    n = lin["w"].shape[1]
    s = jnp.concatenate([jnp.full((n_q_cols,), scale, jnp.float32),
                         jnp.ones((n - n_q_cols,), jnp.float32)])
    return {"w": lin["w"] * s[None, :], "b": lin["b"] * s}


def _bf16(lin):
    return {"w": lin["w"].astype(jnp.bfloat16), "b": lin["b"]}


def _init_ln(E):
    return {"gamma": jnp.ones((E,), jnp.float32), "beta": jnp.zeros((E,), jnp.float32)}


def init_params(key, cfg):
    E, H, I, V = (cfg["embedding_size"], cfg["hidden_size"],
                  cfg["intermediate_size"], cfg["vocab_size"])
    nh = cfg["num_attention_heads"]
    q_scale = 1.0 / math.sqrt(H // nh)
    keys = jax.random.split(key, 2 + 2 * cfg["num_hidden_layers"])
    params = {
        "word_emb": jax.random.normal(keys[0], (V, E), jnp.float32) * 0.02,
        "predict_w": (jax.random.normal(keys[1], (E, V), jnp.float32) * 0.02
                      ).astype(jnp.bfloat16),
        "encoder": [],
        "decoder": [],
    }
    idx = 2
    for _ in range(cfg["num_hidden_layers"]):
        ks = jax.random.split(keys[idx], 4); idx += 1
        params["encoder"].append({
            "attn": {"qkv": _bf16(_fold_q_scale(_init_linear(ks[0], E, 3 * H), H, q_scale))},
            "addnorm_dense": _bf16(_init_linear(ks[1], H, E)),
            "addnorm_ln": _init_ln(E),
            "ffn1": _bf16(_init_linear(ks[2], E, I)),
            "ffn2": _bf16(_init_linear(ks[3], I, E)),
            "ln": _init_ln(E),
        })
    for _ in range(cfg["num_hidden_layers"]):
        ks = jax.random.split(keys[idx], 7); idx += 1
        params["decoder"].append({
            "self_attn": {"qkv": _bf16(_fold_q_scale(_init_linear(ks[0], E, 3 * H), H, q_scale))},
            "self_dense": _bf16(_init_linear(ks[1], H, E)),
            "self_ln": _init_ln(E),
            "mut_attn": {"q": _bf16(_fold_q_scale(_init_linear(ks[2], E, H), H, q_scale)),
                         "kv": _bf16(_init_linear(ks[3], E, 2 * H))},
            "mut_dense": _bf16(_init_linear(ks[4], H, E)),
            "mut_ln": _init_ln(E),
            "ffn1": _bf16(_init_linear(ks[5], E, I)),
            "ffn2": _bf16(_init_linear(ks[6], I, E)),
            "ln": _init_ln(E),
        })
    return params


# ----------------------------------------------------------------------------
# Main
# ----------------------------------------------------------------------------

if __name__ == "__main__":
    cfg = dict(vocab_size=16, embedding_size=32, hidden_size=32,
               num_attention_heads=4, intermediate_size=64,
               num_hidden_layers=2, hidden_dropout_prob=0.1)

    B, S_in, S_out = 2, 8, 8

    key = jax.random.PRNGKey(0)
    k_in, k_out = jax.random.split(key)
    input_ids = jax.random.randint(k_in, (B, S_in), 0, cfg["vocab_size"], dtype=jnp.int32)
    output_ids = jax.random.randint(k_out, (B, S_out), 0, cfg["vocab_size"], dtype=jnp.int32)

    input_mask = jnp.ones((B, S_in, S_in), jnp.float32)
    output_mask = jnp.broadcast_to(
        jnp.tril(jnp.ones((S_out, S_out), jnp.float32))[None], (B, S_out, S_out))
    mutual_mask = jnp.ones((B, S_out, S_in), jnp.float32)

    params = init_params(jax.random.PRNGKey(42), cfg)

    fwd = jax.jit(forward_transformer, static_argnums=6)
    logits = fwd(params, input_ids, output_ids,
                 input_mask, output_mask, mutual_mask,
                 cfg["num_attention_heads"])
    logits = jax.block_until_ready(logits)

    assert logits.shape == (B, S_out, cfg["vocab_size"])
    assert bool(jnp.all(jnp.isfinite(logits)))
    print("KERNEL_OK")
</pallas_src>

<mosaic_0001>
module attributes {stable_mosaic.version = 11 : i64} {
  func.func @_matmul_bias_kernel(%arg0: i32, %arg1: i32, %arg2: i32, %arg3: memref<16x32xf32, #tpu.memory_space<vmem>>, %arg4: memref<32x96xbf16, #tpu.memory_space<vmem>>, %arg5: memref<1x96xf32, #tpu.memory_space<vmem>>, %arg6: memref<16x96xf32, #tpu.memory_space<vmem>>, %arg7: memref<16x96xf32, #tpu.memory_space<vmem>>) attributes {dimension_semantics = [#tpu.dimension_semantics<parallel>, #tpu.dimension_semantics<parallel>, #tpu.dimension_semantics<arbitrary>], iteration_bounds = array<i64: 1, 1, 1>, scalar_prefetch = 0 : i64, scratch_operands = 1 : i64, tpu.core_type = #tpu.core_type<tc>, window_params = [{transform_indices = @transform_0, window_bounds = array<i64: 16, 32>}, {transform_indices = @transform_1, window_bounds = array<i64: 32, 96>}, {transform_indices = @transform_2, window_bounds = array<i64: 1, 96>}, {transform_indices = @transform_3, window_bounds = array<i64: 16, 96>}]} {
    %c0_i32 = arith.constant 0 : i32
    %0 = arith.cmpi eq, %arg2, %c0_i32 : i32
    %1 = arith.extui %0 : i1 to i32
    %c0_i32_0 = arith.constant 0 : i32
    %2 = arith.cmpi ne, %1, %c0_i32_0 : i32
    scf.if %2 {
      %cst_10 = arith.constant 0.000000e+00 : f32
      %13 = vector.broadcast %cst_10 : f32 to vector<16x96xf32>
      %c0_11 = arith.constant 0 : index
      %c0_12 = arith.constant 0 : index
      %14 = vector.load %arg7[%c0_11, %c0_12] : memref<16x96xf32, #tpu.memory_space<vmem>>, vector<16x96xf32>
      tpu.vector_store %arg7[%c0_11, %c0_12], %13 {strides = array<i32>} : memref<16x96xf32, #tpu.memory_space<vmem>>, vector<16x96xf32>,
    } else {
    }
    %c0 = arith.constant 0 : index
    %c0_1 = arith.constant 0 : index
    %3 = vector.load %arg7[%c0, %c0_1] : memref<16x96xf32, #tpu.memory_space<vmem>>, vector<16x96xf32>
    %c0_2 = arith.constant 0 : index
    %c0_3 = arith.constant 0 : index
    %4 = vector.load %arg3[%c0_2, %c0_3] : memref<16x32xf32, #tpu.memory_space<vmem>>, vector<16x32xf32>
    %5 = arith.truncf %4 : vector<16x32xf32> to vector<16x32xbf16>
    %c0_4 = arith.constant 0 : index
    %c0_5 = arith.constant 0 : index
    %6 = vector.load %arg4[%c0_4, %c0_5] : memref<32x96xbf16, #tpu.memory_space<vmem>>, vector<32x96xbf16>
    %cst = arith.constant dense<0.000000e+00> : vector<16x96xf32>
    %7 = tpu.matmul %5, %6, %cst {dimension_numbers = #tpu.dot_dimension_numbers<[1], [0], [0], [1], [0, 0, 1, 1], [], []>} : vector<16x32xbf16>, vector<32x96xbf16>, vector<16x96xf32> -> vector<16x96xf32>
    %8 = arith.addf %3, %7 : vector<16x96xf32>
    %c0_6 = arith.constant 0 : index
    %c0_7 = arith.constant 0 : index
    %9 = vector.load %arg7[%c0_6, %c0_7] : memref<16x96xf32, #tpu.memory_space<vmem>>, vector<16x96xf32>
    tpu.vector_store %arg7[%c0_6, %c0_7], %8 {strides = array<i32>} : memref<16x96xf32, #tpu.memory_space<vmem>>, vector<16x96xf32>,
    %c0_i32_8 = arith.constant 0 : i32
    %10 = arith.cmpi eq, %arg2, %c0_i32_8 : i32
    %11 = arith.extui %10 : i1 to i32
    %c0_i32_9 = arith.constant 0 : i32
    %12 = arith.cmpi ne, %11, %c0_i32_9 : i32
    scf.if %12 {
      %c0_10 = arith.constant 0 : index
      %c0_11 = arith.constant 0 : index
      %13 = vector.load %arg7[%c0_10, %c0_11] : memref<16x96xf32, #tpu.memory_space<vmem>>, vector<16x96xf32>
      %c0_12 = arith.constant 0 : index
      %c0_13 = arith.constant 0 : index
      %14 = vector.load %arg5[%c0_12, %c0_13] : memref<1x96xf32, #tpu.memory_space<vmem>>, vector<1x96xf32>
      %15 = vector.broadcast %14 : vector<1x96xf32> to vector<16x96xf32>
      %16 = arith.addf %13, %15 : vector<16x96xf32>
      %c0_14 = arith.constant 0 : index
      %c0_15 = arith.constant 0 : index
      %17 = vector.load %arg6[%c0_14, %c0_15] : memref<16x96xf32, #tpu.memory_space<vmem>>, vector<16x96xf32>
      tpu.vector_store %arg6[%c0_14, %c0_15], %16 {strides = array<i32>} : memref<16x96xf32, #tpu.memory_space<vmem>>, vector<16x96xf32>,
    } else {
    }
    return
  }
  func.func @transform_0(%arg0: i32, %arg1: i32, %arg2: i32) -> (i32, i32) {
    %c0_i32 = arith.constant 0 : i32
    return %arg0, %arg2 : i32, i32
  }
  func.func @transform_1(%arg0: i32, %arg1: i32, %arg2: i32) -> (i32, i32) {
    %c0_i32 = arith.constant 0 : i32
    return %arg2, %arg1 : i32, i32
  }
  func.func @transform_2(%arg0: i32, %arg1: i32, %arg2: i32) -> (i32, i32) {
    %c0_i32 = arith.constant 0 : i32
    %c0_i32_0 = arith.constant 0 : i32
    return %c0_i32, %arg1 : i32, i32
  }
  func.func @transform_3(%arg0: i32, %arg1: i32, %arg2: i32) -> (i32, i32) {
    %c0_i32 = arith.constant 0 : i32
    return %arg0, %arg1 : i32, i32
  }
}

module attributes {stable_mosaic.version = 11 : i64} {
  func.func @_dense_add_ln_kernel(%arg0: i32, %arg1: memref<8x32xf32, #tpu.memory_space<vmem>>, %arg2: memref<32x32xbf16, #tpu.memory_space<vmem>>, %arg3: memref<1x32xf32, #tpu.memory_space<vmem>>, %arg4: memref<8x32xf32, #tpu.memory_space<vmem>>, %arg5: memref<1x32xf32, #tpu.memory_space<vmem>>, %arg6: memref<1x32xf32, #tpu.memory_space<vmem>>, %arg7: memref<8x32xf32, #tpu.memory_space<vmem>>) attributes {dimension_semantics = [#tpu.dimension_semantics<parallel>], iteration_bounds = array<i64: 2>, scalar_prefetch = 0 : i64, scratch_operands = 0 : i64, tpu.core_type = #tpu.core_type<tc>, window_params = [{transform_indices = @transform_0, window_bounds = array<i64: 8, 32>}, {pipeline_mode = #tpu.pipeline_mode<synchronous>, transform_indices = @transform_1, window_bounds = array<i64: 32, 32>}, {pipeline_mode = #tpu.pipeline_mode<synchronous>, transform_indices = @transform_2, window_bounds = array<i64: 1, 32>}, {transform_indices = @transform_3, window_bounds = array<i64: 8, 32>}, {pipeline_mode = #tpu.pipeline_mode<synchronous>, transform_indices = @transform_4, window_bounds = array<i64: 1, 32>}, {pipeline_mode = #tpu.pipeline_mode<synchronous>, transform_indices = @transform_5, window_bounds = array<i64: 1, 32>}, {transform_indices = @transform_6, window_bounds = array<i64: 8, 32>}]} {
    %c0 = arith.constant 0 : index
    %c0_0 = arith.constant 0 : index
    %0 = vector.load %arg1[%c0, %c0_0] : memref<8x32xf32, #tpu.memory_space<vmem>>, vector<8x32xf32>
    %1 = arith.truncf %0 : vector<8x32xf32> to vector<8x32xbf16>
    %c0_1 = arith.constant 0 : index
    %c0_2 = arith.constant 0 : index
    %2 = vector.load %arg2[%c0_1, %c0_2] : memref<32x32xbf16, #tpu.memory_space<vmem>>, vector<32x32xbf16>
    %cst = arith.constant dense<0.000000e+00> : vector<8x32xf32>
    %3 = tpu.matmul %1, %2, %cst {dimension_numbers = #tpu.dot_dimension_numbers<[1], [0], [0], [1], [0, 0, 1, 1], [], []>} : vector<8x32xbf16>, vector<32x32xbf16>, vector<8x32xf32> -> vector<8x32xf32>
    %c0_3 = arith.constant 0 : index
    %c0_4 = arith.constant 0 : index
    %4 = vector.load %arg3[%c0_3, %c0_4] : memref<1x32xf32, #tpu.memory_space<vmem>>, vector<1x32xf32>
    %5 = vector.broadcast %4 : vector<1x32xf32> to vector<8x32xf32>
    %6 = arith.addf %3, %5 : vector<8x32xf32>
    %c0_5 = arith.constant 0 : index
    %c0_6 = arith.constant 0 : index
    %7 = vector.load %arg4[%c0_5, %c0_6] : memref<8x32xf32, #tpu.memory_space<vmem>>, vector<8x32xf32>
    %8 = arith.addf %6, %7 : vector<8x32xf32>
    %c0_7 = arith.constant 0 : index
    %c0_8 = arith.constant 0 : index
    %9 = vector.load %arg5[%c0_7, %c0_8] : memref<1x32xf32, #tpu.memory_space<vmem>>, vector<1x32xf32>
    %c0_9 = arith.constant 0 : index
    %c0_10 = arith.constant 0 : index
    %10 = vector.load %arg6[%c0_9, %c0_10] : memref<1x32xf32, #tpu.memory_space<vmem>>, vector<1x32xf32>
    %cst_11 = arith.constant dense<0.000000e+00> : vector<8xf32>
    %11 = vector.multi_reduction <add>, %8, %cst_11 [1] : vector<8x32xf32> to vector<8xf32>
    %12 = vector.shape_cast %11 : vector<8xf32> to vector<8x1xf32>
    %cst_12 = arith.constant 3.200000e+01 : f32
    %13 = vector.broadcast %cst_12 : f32 to vector<8x1xf32>
    %14 = arith.divf %12, %13 : vector<8x1xf32>
    %15 = vector.broadcast %14 : vector<8x1xf32> to vector<8x32xf32>
    %16 = arith.subf %8, %15 : vector<8x32xf32>
    %17 = arith.mulf %16, %16 : vector<8x32xf32>
    %cst_13 = arith.constant dense<0.000000e+00> : vector<8xf32>
    %18 = vector.multi_reduction <add>, %17, %cst_13 [1] : vector<8x32xf32> to vector<8xf32>
    %19 = vector.shape_cast %18 : vector<8xf32> to vector<8x1xf32>
    %cst_14 = arith.constant 3.200000e+01 : f32
    %20 = vector.broadcast %cst_14 : f32 to vector<8x1xf32>
    %21 = arith.divf %19, %20 : vector<8x1xf32>
    %22 = vector.broadcast %14 : vector<8x1xf32> to vector<8x32xf32>
    %23 = arith.subf %8, %22 : vector<8x32xf32>
    %cst_15 = arith.constant 9.99999996E-13 : f32
    %24 = vector.broadcast %cst_15 : f32 to vector<8x1xf32>
    %25 = arith.addf %21, %24 : vector<8x1xf32>
    %26 = math.rsqrt %25 : vector<8x1xf32>
    %27 = vector.broadcast %26 : vector<8x1xf32> to vector<8x32xf32>
    %28 = arith.mulf %23, %27 : vector<8x32xf32>
    %29 = vector.broadcast %9 : vector<1x32xf32> to vector<8x32xf32>
    %30 = arith.mulf %29, %28 : vector<8x32xf32>
    %31 = vector.broadcast %10 : vector<1x32xf32> to vector<8x32xf32>
    %32 = arith.addf %30, %31 : vector<8x32xf32>
    %c0_16 = arith.constant 0 : index
    %c0_17 = arith.constant 0 : index
    %33 = vector.load %arg7[%c0_16, %c0_17] : memref<8x32xf32, #tpu.memory_space<vmem>>, vector<8x32xf32>
    tpu.vector_store %arg7[%c0_16, %c0_17], %32 {strides = array<i32>} : memref<8x32xf32, #tpu.memory_space<vmem>>, vector<8x32xf32>,
    return
  }
  func.func @transform_0(%arg0: i32) -> (i32, i32) {
    %c0_i32 = arith.constant 0 : i32
    %c0_i32_0 = arith.constant 0 : i32
    return %arg0, %c0_i32 : i32, i32
  }
  func.func @transform_1(%arg0: i32) -> (i32, i32) {
    %c0_i32 = arith.constant 0 : i32
    %c0_i32_0 = arith.constant 0 : i32
    %c0_i32_1 = arith.constant 0 : i32
    return %c0_i32, %c0_i32_0 : i32, i32
  }
  func.func @transform_2(%arg0: i32) -> (i32, i32) {
    %c0_i32 = arith.constant 0 : i32
    %c0_i32_0 = arith.constant 0 : i32
    %c0_i32_1 = arith.constant 0 : i32
    return %c0_i32, %c0_i32_0 : i32, i32
  }
  func.func @transform_3(%arg0: i32) -> (i32, i32) {
    %c0_i32 = arith.constant 0 : i32
    %c0_i32_0 = arith.constant 0 : i32
    return %arg0, %c0_i32 : i32, i32
  }
  func.func @transform_4(%arg0: i32) -> (i32, i32) {
    %c0_i32 = arith.constant 0 : i32
    %c0_i32_0 = arith.constant 0 : i32
    %c0_i32_1 = arith.constant 0 : i32
    return %c0_i32, %c0_i32_0 : i32, i32
  }
  func.func @transform_5(%arg0: i32) -> (i32, i32) {
    %c0_i32 = arith.constant 0 : i32
    %c0_i32_0 = arith.constant 0 : i32
    %c0_i32_1 = arith.constant 0 : i32
    return %c0_i32, %c0_i32_0 : i32, i32
  }
  func.func @transform_6(%arg0: i32) -> (i32, i32) {
    %c0_i32 = arith.constant 0 : i32
    %c0_i32_0 = arith.constant 0 : i32
    return %arg0, %c0_i32 : i32, i32
  }
}

module attributes {stable_mosaic.version = 11 : i64} {
  func.func @_self_attn_kernel(%arg0: i32, %arg1: memref<1x8x96xf32, #tpu.memory_space<vmem>>, %arg2: memref<1x8x8xi8, #tpu.memory_space<vmem>>, %arg3: memref<1x8x32xf32, #tpu.memory_space<vmem>>) attributes {dimension_semantics = [#tpu.dimension_semantics<parallel>], iteration_bounds = array<i64: 2>, scalar_prefetch = 0 : i64, scratch_operands = 0 : i64, tpu.core_type = #tpu.core_type<tc>, window_params = [{transform_indices = @transform_0, window_bounds = array<i64: 1, 8, 96>}, {transform_indices = @transform_1, window_bounds = array<i64: 1, 8, 8>}, {transform_indices = @transform_2, window_bounds = array<i64: 1, 8, 32>}]} {
    %c0 = arith.constant 0 : index
    %c0_0 = arith.constant 0 : index
    %c0_1 = arith.constant 0 : index
    %0 = vector.load %arg2[%c0, %c0_0, %c0_1] : memref<1x8x8xi8, #tpu.memory_space<vmem>>, vector<1x8x8xi8>
    %1 = vector.shape_cast %0 : vector<1x8x8xi8> to vector<8x8xi8>
    %2 = arith.sitofp %1 : vector<8x8xi8> to vector<8x8xf32>
    %cst = arith.constant 1.000000e+00 : f32
    %3 = vector.broadcast %cst : f32 to vector<8x8xf32>
    %4 = arith.subf %3, %2 : vector<8x8xf32>
    %cst_2 = arith.constant -1.000000e+04 : f32
    %5 = vector.broadcast %cst_2 : f32 to vector<8x8xf32>
    %6 = arith.mulf %4, %5 : vector<8x8xf32>
    %c0_3 = arith.constant 0 : index
    %c0_4 = arith.constant 0 : index
    %c0_5 = arith.constant 0 : index
    %7 = vector.load %arg1[%c0_3, %c0_4, %c0_5] : memref<1x8x96xf32, #tpu.memory_space<vmem>>, vector<1x8x8xf32>
    %8 = vector.shape_cast %7 : vector<1x8x8xf32> to vector<8x8xf32>
    %9 = arith.truncf %8 : vector<8x8xf32> to vector<8x8xbf16>
    %c0_6 = arith.constant 0 : index
    %c0_7 = arith.constant 0 : index
    %c32 = arith.constant 32 : index
    %10 = vector.load %arg1[%c0_6, %c0_7, %c32] : memref<1x8x96xf32, #tpu.memory_space<vmem>>, vector<1x8x8xf32>
    %11 = vector.shape_cast %10 : vector<1x8x8xf32> to vector<8x8xf32>
    %12 = arith.truncf %11 : vector<8x8xf32> to vector<8x8xbf16>
    %c0_8 = arith.constant 0 : index
    %c0_9 = arith.constant 0 : index
    %c64 = arith.constant 64 : index
    %13 = vector.load %arg1[%c0_8, %c0_9, %c64] : memref<1x8x96xf32, #tpu.memory_space<vmem>>, vector<1x8x8xf32>
    %14 = vector.shape_cast %13 : vector<1x8x8xf32> to vector<8x8xf32>
    %15 = arith.truncf %14 : vector<8x8xf32> to vector<8x8xbf16>
    %cst_10 = arith.constant dense<0.000000e+00> : vector<8x8xf32>
    %16 = tpu.matmul %9, %12, %cst_10 {dimension_numbers = #tpu.dot_dimension_numbers<[1], [1], [0], [0], [0, 0, 1, 0], [], []>} : vector<8x8xbf16>, vector<8x8xbf16>, vector<8x8xf32> -> vector<8x8xf32>
    %17 = arith.addf %16, %6 : vector<8x8xf32>
    %cst_11 = arith.constant dense<0xFF800000> : vector<8xf32>
    %18 = vector.multi_reduction <maximumf>, %17, %cst_11 [1] : vector<8x8xf32> to vector<8xf32>
    %19 = vector.shape_cast %18 : vector<8xf32> to vector<8x1xf32>
    %20 = vector.broadcast %19 : vector<8x1xf32> to vector<8x8xf32>
    %21 = arith.subf %17, %20 : vector<8x8xf32>
    %22 = math.exp %21 : vector<8x8xf32>
    %cst_12 = arith.constant dense<0.000000e+00> : vector<8xf32>
    %23 = vector.multi_reduction <add>, %22, %cst_12 [1] : vector<8x8xf32> to vector<8xf32>
    %24 = vector.shape_cast %23 : vector<8xf32> to vector<8x1xf32>
    %25 = tpu.reciprocal %24 {approx = true} : vector<8x1xf32> -> vector<8x1xf32>
    %26 = vector.broadcast %25 : vector<8x1xf32> to vector<8x8xf32>
    %27 = arith.mulf %22, %26 : vector<8x8xf32>
    %28 = arith.truncf %27 : vector<8x8xf32> to vector<8x8xbf16>
    %cst_13 = arith.constant dense<0.000000e+00> : vector<8x8xf32>
    %29 = tpu.matmul %28, %15, %cst_13 {dimension_numbers = #tpu.dot_dimension_numbers<[1], [0], [0], [1], [0, 0, 1, 1], [], []>} : vector<8x8xbf16>, vector<8x8xbf16>, vector<8x8xf32> -> vector<8x8xf32>
    %c0_14 = arith.constant 0 : index
    %c0_15 = arith.constant 0 : index
    %c0_16 = arith.constant 0 : index
    %30 = vector.load %arg3[%c0_14, %c0_15, %c0_16] : memref<1x8x32xf32, #tpu.memory_space<vmem>>, vector<1x8x8xf32>
    %31 = vector.shape_cast %30 : vector<1x8x8xf32> to vector<8x8xf32>
    %32 = vector.shape_cast %29 : vector<8x8xf32> to vector<1x8x8xf32>
    tpu.vector_store %arg3[%c0_14, %c0_15, %c0_16], %32 {strides = array<i32>} : memref<1x8x32xf32, #tpu.memory_space<vmem>>, vector<1x8x8xf32>,
    %c0_17 = arith.constant 0 : index
    %c0_18 = arith.constant 0 : index
    %c8 = arith.constant 8 : index
    %33 = vector.load %arg1[%c0_17, %c0_18, %c8] : memref<1x8x96xf32, #tpu.memory_space<vmem>>, vector<1x8x8xf32>
    %34 = vector.shape_cast %33 : vector<1x8x8xf32> to vector<8x8xf32>
    %35 = arith.truncf %34 : vector<8x8xf32> to vector<8x8xbf16>
    %c0_19 = arith.constant 0 : index
    %c0_20 = arith.constant 0 : index
    %c40 = arith.constant 40 : index
    %36 = vector.load %arg1[%c0_19, %c0_20, %c40] : memref<1x8x96xf32, #tpu.memory_space<vmem>>, vector<1x8x8xf32>
    %37 = vector.shape_cast %36 : vector<1x8x8xf32> to vector<8x8xf32>
    %38 = arith.truncf %37 : vector<8x8xf32> to vector<8x8xbf16>
    %c0_21 = arith.constant 0 : index
    %c0_22 = arith.constant 0 : index
    %c72 = arith.constant 72 : index
    %39 = vector.load %arg1[%c0_21, %c0_22, %c72] : memref<1x8x96xf32, #tpu.memory_space<vmem>>, vector<1x8x8xf32>
    %40 = vector.shape_cast %39 : vector<1x8x8xf32> to vector<8x8xf32>
    %41 = arith.truncf %40 : vector<8x8xf32> to vector<8x8xbf16>
    %cst_23 = arith.constant dense<0.000000e+00> : vector<8x8xf32>
    %42 = tpu.matmul %35, %38, %cst_23 {dimension_numbers = #tpu.dot_dimension_numbers<[1], [1], [0], [0], [0, 0, 1, 0], [], []>} : vector<8x8xbf16>, vector<8x8xbf16>, vector<8x8xf32> -> vector<8x8xf32>
    %43 = arith.addf %42, %6 : vector<8x8xf32>
    %cst_24 = arith.constant dense<0xFF800000> : vector<8xf32>
    %44 = vector.multi_reduction <maximumf>, %43, %cst_24 [1] : vector<8x8xf32> to vector<8xf32>
    %45 = vector.shape_cast %44 : vector<8xf32> to vector<8x1xf32>
    %46 = vector.broadcast %45 : vector<8x1xf32> to vector<8x8xf32>
    %47 = arith.subf %43, %46 : vector<8x8xf32>
    %48 = math.exp %47 : vector<8x8xf32>
    %cst_25 = arith.constant dense<0.000000e+00> : vector<8xf32>
    %49 = vector.multi_reduction <add>, %48, %cst_25 [1] : vector<8x8xf32> to vector<8xf32>
    %50 = vector.shape_cast %49 : vector<8xf32> to vector<8x1xf32>
    %51 = tpu.reciprocal %50 {approx = true} : vector<8x1xf32> -> vector<8x1xf32>
    %52 = vector.broadcast %51 : vector<8x1xf32> to vector<8x8xf32>
    %53 = arith.mulf %48, %52 : vector<8x8xf32>
    %54 = arith.truncf %53 : vector<8x8xf32> to vector<8x8xbf16>
    %cst_26 = arith.constant dense<0.000000e+00> : vector<8x8xf32>
    %55 = tpu.matmul %54, %41, %cst_26 {dimension_numbers = #tpu.dot_dimension_numbers<[1], [0], [0], [1], [0, 0, 1, 1], [], []>} : vector<8x8xbf16>, vector<8x8xbf16>, vector<8x8xf32> -> vector<8x8xf32>
    %c0_27 = arith.constant 0 : index
    %c0_28 = arith.constant 0 : index
    %c8_29 = arith.constant 8 : index
    %56 = vector.load %arg3[%c0_27, %c0_28, %c8_29] : memref<1x8x32xf32, #tpu.memory_space<vmem>>, vector<1x8x8xf32>
    %57 = vector.shape_cast %56 : vector<1x8x8xf32> to vector<8x8xf32>
    %58 = vector.shape_cast %55 : vector<8x8xf32> to vector<1x8x8xf32>
    tpu.vector_store %arg3[%c0_27, %c0_28, %c8_29], %58 {strides = array<i32>} : memref<1x8x32xf32, #tpu.memory_space<vmem>>, vector<1x8x8xf32>,
    %c0_30 = arith.constant 0 : index
    %c0_31 = arith.constant 0 : index
    %c16 = arith.constant 16 : index
    %59 = vector.load %arg1[%c0_30, %c0_31, %c16] : memref<1x8x96xf32, #tpu.memory_space<vmem>>, vector<1x8x8xf32>
    %60 = vector.shape_cast %59 : vector<1x8x8xf32> to vector<8x8xf32>
    %61 = arith.truncf %60 : vector<8x8xf32> to vector<8x8xbf16>
    %c0_32 = arith.constant 0 : index
    %c0_33 = arith.constant 0 : index
    %c48 = arith.constant 48 : index
    %62 = vector.load %arg1[%c0_32, %c0_33, %c48] : memref<1x8x96xf32, #tpu.memory_space<vmem>>, vector<1x8x8xf32>
    %63 = vector.shape_cast %62 : vector<1x8x8xf32> to vector<8x8xf32>
    %64 = arith.truncf %63 : vector<8x8xf32> to vector<8x8xbf16>
    %c0_34 = arith.constant 0 : index
    %c0_35 = arith.constant 0 : index
    %c80 = arith.constant 80 : index
    %65 = vector.load %arg1[%c0_34, %c0_35, %c80] : memref<1x8x96xf32, #tpu.memory_space<vmem>>, vector<1x8x8xf32>
    %66 = vector.shape_cast %65 : vector<1x8x8xf32> to vector<8x8xf32>
    %67 = arith.truncf %66 : vector<8x8xf32> to vector<8x8xbf16>
    %cst_36 = arith.constant dense<0.000000e+00> : vector<8x8xf32>
    %68 = tpu.matmul %61, %64, %cst_36 {dimension_numbers = #tpu.dot_dimension_numbers<[1], [1], [0], [0], [0, 0, 1, 0], [], []>} : vector<8x8xbf16>, vector<8x8xbf16>, vector<8x8xf32> -> vector<8x8xf32>
    %69 = arith.addf %68, %6 : vector<8x8xf32>
    %cst_37 = arith.constant dense<0xFF800000> : vector<8xf32>
    %70 = vector.multi_reduction <maximumf>, %69, %cst_37 [1] : vector<8x8xf32> to vector<8xf32>
    %71 = vector.shape_cast %70 : vector<8xf32> to vector<8x1xf32>
    %72 = vector.broadcast %71 : vector<8x1xf32> to vector<8x8xf32>
    %73 = arith.subf %69, %72 : vector<8x8xf32>
    %74 = math.exp %73 : vector<8x8xf32>
    %cst_38 = arith.constant dense<0.000000e+00> : vector<8xf32>
    %75 = vector.multi_reduction <add>, %74, %cst_38 [1] : vector<8x8xf32> to vector<8xf32>
    %76 = vector.shape_cast %75 : vector<8xf32> to vector<8x1xf32>
    %77 = tpu.reciprocal %76 {approx = true} : vector<8x1xf32> -> vector<8x1xf32>
    %78 = vector.broadcast %77 : vector<8x1xf32> to vector<8x8xf32>
    %79 = arith.mulf %74, %78 : vector<8x8xf32>
    %80 = arith.truncf %79 : vector<8x8xf32> to vector<8x8xbf16>
    %cst_39 = arith.constant dense<0.000000e+00> : vector<8x8xf32>
    %81 = tpu.matmul %80, %67, %cst_39 {dimension_numbers = #tpu.dot_dimension_numbers<[1], [0], [0], [1], [0, 0, 1, 1], [], []>} : vector<8x8xbf16>, vector<8x8xbf16>, vector<8x8xf32> -> vector<8x8xf32>
    %c0_40 = arith.constant 0 : index
    %c0_41 = arith.constant 0 : index
    %c16_42 = arith.constant 16 : index
    %82 = vector.load %arg3[%c0_40, %c0_41, %c16_42] : memref<1x8x32xf32, #tpu.memory_space<vmem>>, vector<1x8x8xf32>
    %83 = vector.shape_cast %82 : vector<1x8x8xf32> to vector<8x8xf32>
    %84 = vector.shape_cast %81 : vector<8x8xf32> to vector<1x8x8xf32>
    tpu.vector_store %arg3[%c0_40, %c0_41, %c16_42], %84 {strides = array<i32>} : memref<1x8x32xf32, #tpu.memory_space<vmem>>, vector<1x8x8xf32>,
    %c0_43 = arith.constant 0 : index
    %c0_44 = arith.constant 0 : index
    %c24 = arith.constant 24 : index
    %85 = vector.load %arg1[%c0_43, %c0_44, %c24] : memref<1x8x96xf32, #tpu.memory_space<vmem>>, vector<1x8x8xf32>
    %86 = vector.shape_cast %85 : vector<1x8x8xf32> to vector<8x8xf32>
    %87 = arith.truncf %86 : vector<8x8xf32> to vector<8x8xbf16>
    %c0_45 = arith.constant 0 : index
    %c0_46 = arith.constant 0 : index
    %c56 = arith.constant 56 : index
    %88 = vector.load %arg1[%c0_45, %c0_46, %c56] : memref<1x8x96xf32, #tpu.memory_space<vmem>>, vector<1x8x8xf32>
    %89 = vector.shape_cast %88 : vector<1x8x8xf32> to vector<8x8xf32>
    %90 = arith.truncf %89 : vector<8x8xf32> to vector<8x8xbf16>
    %c0_47 = arith.constant 0 : index
    %c0_48 = arith.constant 0 : index
    %c88 = arith.constant 88 : index
    %91 = vector.load %arg1[%c0_47, %c0_48, %c88] : memref<1x8x96xf32, #tpu.memory_space<vmem>>, vector<1x8x8xf32>
    %92 = vector.shape_cast %91 : vector<1x8x8xf32> to vector<8x8xf32>
    %93 = arith.truncf %92 : vector<8x8xf32> to vector<8x8xbf16>
    %cst_49 = arith.constant dense<0.000000e+00> : vector<8x8xf32>
    %94 = tpu.matmul %87, %90, %cst_49 {dimension_numbers = #tpu.dot_dimension_numbers<[1], [1], [0], [0], [0, 0, 1, 0], [], []>} : vector<8x8xbf16>, vector<8x8xbf16>, vector<8x8xf32> -> vector<8x8xf32>
    %95 = arith.addf %94, %6 : vector<8x8xf32>
    %cst_50 = arith.constant dense<0xFF800000> : vector<8xf32>
    %96 = vector.multi_reduction <maximumf>, %95, %cst_50 [1] : vector<8x8xf32> to vector<8xf32>
    %97 = vector.shape_cast %96 : vector<8xf32> to vector<8x1xf32>
    %98 = vector.broadcast %97 : vector<8x1xf32> to vector<8x8xf32>
    %99 = arith.subf %95, %98 : vector<8x8xf32>
    %100 = math.exp %99 : vector<8x8xf32>
    %cst_51 = arith.constant dense<0.000000e+00> : vector<8xf32>
    %101 = vector.multi_reduction <add>, %100, %cst_51 [1] : vector<8x8xf32> to vector<8xf32>
    %102 = vector.shape_cast %101 : vector<8xf32> to vector<8x1xf32>
    %103 = tpu.reciprocal %102 {approx = true} : vector<8x1xf32> -> vector<8x1xf32>
    %104 = vector.broadcast %103 : vector<8x1xf32> to vector<8x8xf32>
    %105 = arith.mulf %100, %104 : vector<8x8xf32>
    %106 = arith.truncf %105 : vector<8x8xf32> to vector<8x8xbf16>
    %cst_52 = arith.constant dense<0.000000e+00> : vector<8x8xf32>
    %107 = tpu.matmul %106, %93, %cst_52 {dimension_numbers = #tpu.dot_dimension_numbers<[1], [0], [0], [1], [0, 0, 1, 1], [], []>} : vector<8x8xbf16>, vector<8x8xbf16>, vector<8x8xf32> -> vector<8x8xf32>
    %c0_53 = arith.constant 0 : index
    %c0_54 = arith.constant 0 : index
    %c24_55 = arith.constant 24 : index
    %108 = vector.load %arg3[%c0_53, %c0_54, %c24_55] : memref<1x8x32xf32, #tpu.memory_space<vmem>>, vector<1x8x8xf32>
    %109 = vector.shape_cast %108 : vector<1x8x8xf32> to vector<8x8xf32>
    %110 = vector.shape_cast %107 : vector<8x8xf32> to vector<1x8x8xf32>
    tpu.vector_store %arg3[%c0_53, %c0_54, %c24_55], %110 {strides = array<i32>} : memref<1x8x32xf32, #tpu.memory_space<vmem>>, vector<1x8x8xf32>,
    return
  }
  func.func @transform_0(%arg0: i32) -> (i32, i32, i32) {
    %c0_i32 = arith.constant 0 : i32
    %c0_i32_0 = arith.constant 0 : i32
    %c0_i32_1 = arith.constant 0 : i32
    return %arg0, %c0_i32, %c0_i32_0 : i32, i32, i32
  }
  func.func @transform_1(%arg0: i32) -> (i32, i32, i32) {
    %c0_i32 = arith.constant 0 : i32
    %c0_i32_0 = arith.constant 0 : i32
    %c0_i32_1 = arith.constant 0 : i32
    return %arg0, %c0_i32, %c0_i32_0 : i32, i32, i32
  }
  func.func @transform_2(%arg0: i32) -> (i32, i32, i32) {
    %c0_i32 = arith.constant 0 : i32
    %c0_i32_0 = arith.constant 0 : i32
    %c0_i32_1 = arith.constant 0 : i32
    return %arg0, %c0_i32, %c0_i32_0 : i32, i32, i32
  }
}

module attributes {stable_mosaic.version = 11 : i64} {
  func.func @_ffn_add_ln_kernel(%arg0: i32, %arg1: memref<8x32xf32, #tpu.memory_space<vmem>>, %arg2: memref<32x64xbf16, #tpu.memory_space<vmem>>, %arg3: memref<1x64xf32, #tpu.memory_space<vmem>>, %arg4: memref<64x32xbf16, #tpu.memory_space<vmem>>, %arg5: memref<1x32xf32, #tpu.memory_space<vmem>>, %arg6: memref<1x32xf32, #tpu.memory_space<vmem>>, %arg7: memref<1x32xf32, #tpu.memory_space<vmem>>, %arg8: memref<8x32xf32, #tpu.memory_space<vmem>>) attributes {dimension_semantics = [#tpu.dimension_semantics<parallel>], iteration_bounds = array<i64: 2>, scalar_prefetch = 0 : i64, scratch_operands = 0 : i64, tpu.core_type = #tpu.core_type<tc>, window_params = [{transform_indices = @transform_0, window_bounds = array<i64: 8, 32>}, {pipeline_mode = #tpu.pipeline_mode<synchronous>, transform_indices = @transform_1, window_bounds = array<i64: 32, 64>}, {pipeline_mode = #tpu.pipeline_mode<synchronous>, transform_indices = @transform_2, window_bounds = array<i64: 1, 64>}, {pipeline_mode = #tpu.pipeline_mode<synchronous>, transform_indices = @transform_3, window_bounds = array<i64: 64, 32>}, {pipeline_mode = #tpu.pipeline_mode<synchronous>, transform_indices = @transform_4, window_bounds = array<i64: 1, 32>}, {pipeline_mode = #tpu.pipeline_mode<synchronous>, transform_indices = @transform_5, window_bounds = array<i64: 1, 32>}, {pipeline_mode = #tpu.pipeline_mode<synchronous>, transform_indices = @transform_6, window_bounds = array<i64: 1, 32>}, {transform_indices = @transform_7, window_bounds = array<i64: 8, 32>}]} {
    %c0 = arith.constant 0 : index
    %c0_0 = arith.constant 0 : index
    %0 = vector.load %arg1[%c0, %c0_0] : memref<8x32xf32, #tpu.memory_space<vmem>>, vector<8x32xf32>
    %1 = arith.truncf %0 : vector<8x32xf32> to vector<8x32xbf16>
    %c0_1 = arith.constant 0 : index
    %c0_2 = arith.constant 0 : index
    %2 = vector.load %arg2[%c0_1, %c0_2] : memref<32x64xbf16, #tpu.memory_space<vmem>>, vector<32x64xbf16>
    %cst = arith.constant dense<0.000000e+00> : vector<8x64xf32>
    %3 = tpu.matmul %1, %2, %cst {dimension_numbers = #tpu.dot_dimension_numbers<[1], [0], [0], [1], [0, 0, 1, 1], [], []>} : vector<8x32xbf16>, vector<32x64xbf16>, vector<8x64xf32> -> vector<8x64xf32>
    %c0_3 = arith.constant 0 : index
    %c0_4 = arith.constant 0 : index
    %4 = vector.load %arg3[%c0_3, %c0_4] : memref<1x64xf32, #tpu.memory_space<vmem>>, vector<1x64xf32>
    %5 = vector.broadcast %4 : vector<1x64xf32> to vector<8x64xf32>
    %6 = arith.addf %3, %5 : vector<8x64xf32>
    %cst_5 = arith.constant 0.000000e+00 : f32
    %7 = vector.broadcast %cst_5 : f32 to vector<8x64xf32>
    %8 = arith.maximumf %6, %7 : vector<8x64xf32>
    %9 = arith.truncf %8 : vector<8x64xf32> to vector<8x64xbf16>
    %c0_6 = arith.constant 0 : index
    %c0_7 = arith.constant 0 : index
    %10 = vector.load %arg4[%c0_6, %c0_7] : memref<64x32xbf16, #tpu.memory_space<vmem>>, vector<64x32xbf16>
    %cst_8 = arith.constant dense<0.000000e+00> : vector<8x32xf32>
    %11 = tpu.matmul %9, %10, %cst_8 {dimension_numbers = #tpu.dot_dimension_numbers<[1], [0], [0], [1], [0, 0, 1, 1], [], []>} : vector<8x64xbf16>, vector<64x32xbf16>, vector<8x32xf32> -> vector<8x32xf32>
    %c0_9 = arith.constant 0 : index
    %c0_10 = arith.constant 0 : index
    %12 = vector.load %arg5[%c0_9, %c0_10] : memref<1x32xf32, #tpu.memory_space<vmem>>, vector<1x32xf32>
    %13 = vector.broadcast %12 : vector<1x32xf32> to vector<8x32xf32>
    %14 = arith.addf %11, %13 : vector<8x32xf32>
    %15 = arith.addf %14, %0 : vector<8x32xf32>
    %c0_11 = arith.constant 0 : index
    %c0_12 = arith.constant 0 : index
    %16 = vector.load %arg6[%c0_11, %c0_12] : memref<1x32xf32, #tpu.memory_space<vmem>>, vector<1x32xf32>
    %c0_13 = arith.constant 0 : index
    %c0_14 = arith.constant 0 : index
    %17 = vector.load %arg7[%c0_13, %c0_14] : memref<1x32xf32, #tpu.memory_space<vmem>>, vector<1x32xf32>
    %cst_15 = arith.constant dense<0.000000e+00> : vector<8xf32>
    %18 = vector.multi_reduction <add>, %15, %cst_15 [1] : vector<8x32xf32> to vector<8xf32>
    %19 = vector.shape_cast %18 : vector<8xf32> to vector<8x1xf32>
    %cst_16 = arith.constant 3.200000e+01 : f32
    %20 = vector.broadcast %cst_16 : f32 to vector<8x1xf32>
    %21 = arith.divf %19, %20 : vector<8x1xf32>
    %22 = vector.broadcast %21 : vector<8x1xf32> to vector<8x32xf32>
    %23 = arith.subf %15, %22 : vector<8x32xf32>
    %24 = arith.mulf %23, %23 : vector<8x32xf32>
    %cst_17 = arith.constant dense<0.000000e+00> : vector<8xf32>
    %25 = vector.multi_reduction <add>, %24, %cst_17 [1] : vector<8x32xf32> to vector<8xf32>
    %26 = vector.shape_cast %25 : vector<8xf32> to vector<8x1xf32>
    %cst_18 = arith.constant 3.200000e+01 : f32
    %27 = vector.broadcast %cst_18 : f32 to vector<8x1xf32>
    %28 = arith.divf %26, %27 : vector<8x1xf32>
    %29 = vector.broadcast %21 : vector<8x1xf32> to vector<8x32xf32>
    %30 = arith.subf %15, %29 : vector<8x32xf32>
    %cst_19 = arith.constant 9.99999996E-13 : f32
    %31 = vector.broadcast %cst_19 : f32 to vector<8x1xf32>
    %32 = arith.addf %28, %31 : vector<8x1xf32>
    %33 = math.rsqrt %32 : vector<8x1xf32>
    %34 = vector.broadcast %33 : vector<8x1xf32> to vector<8x32xf32>
    %35 = arith.mulf %30, %34 : vector<8x32xf32>
    %36 = vector.broadcast %16 : vector<1x32xf32> to vector<8x32xf32>
    %37 = arith.mulf %36, %35 : vector<8x32xf32>
    %38 = vector.broadcast %17 : vector<1x32xf32> to vector<8x32xf32>
    %39 = arith.addf %37, %38 : vector<8x32xf32>
    %c0_20 = arith.constant 0 : index
    %c0_21 = arith.constant 0 : index
    %40 = vector.load %arg8[%c0_20, %c0_21] : memref<8x32xf32, #tpu.memory_space<vmem>>, vector<8x32xf32>
    tpu.vector_store %arg8[%c0_20, %c0_21], %39 {strides = array<i32>} : memref<8x32xf32, #tpu.memory_space<vmem>>, vector<8x32xf32>,
    return
  }
  func.func @transform_0(%arg0: i32) -> (i32, i32) {
    %c0_i32 = arith.constant 0 : i32
    %c0_i32_0 = arith.constant 0 : i32
    return %arg0, %c0_i32 : i32, i32
  }
  func.func @transform_1(%arg0: i32) -> (i32, i32) {
    %c0_i32 = arith.constant 0 : i32
    %c0_i32_0 = arith.constant 0 : i32
    %c0_i32_1 = arith.constant 0 : i32
    return %c0_i32, %c0_i32_0 : i32, i32
  }
  func.func @transform_2(%arg0: i32) -> (i32, i32) {
    %c0_i32 = arith.constant 0 : i32
    %c0_i32_0 = arith.constant 0 : i32
    %c0_i32_1 = arith.constant 0 : i32
    return %c0_i32, %c0_i32_0 : i32, i32
  }
  func.func @transform_3(%arg0: i32) -> (i32, i32) {
    %c0_i32 = arith.constant 0 : i32
    %c0_i32_0 = arith.constant 0 : i32
    %c0_i32_1 = arith.constant 0 : i32
    return %c0_i32, %c0_i32_0 : i32, i32
  }
  func.func @transform_4(%arg0: i32) -> (i32, i32) {
    %c0_i32 = arith.constant 0 : i32
    %c0_i32_0 = arith.constant 0 : i32
    %c0_i32_1 = arith.constant 0 : i32
    return %c0_i32, %c0_i32_0 : i32, i32
  }
  func.func @transform_5(%arg0: i32) -> (i32, i32) {
    %c0_i32 = arith.constant 0 : i32
    %c0_i32_0 = arith.constant 0 : i32
    %c0_i32_1 = arith.constant 0 : i32
    return %c0_i32, %c0_i32_0 : i32, i32
  }
  func.func @transform_6(%arg0: i32) -> (i32, i32) {
    %c0_i32 = arith.constant 0 : i32
    %c0_i32_0 = arith.constant 0 : i32
    %c0_i32_1 = arith.constant 0 : i32
    return %c0_i32, %c0_i32_0 : i32, i32
  }
  func.func @transform_7(%arg0: i32) -> (i32, i32) {
    %c0_i32 = arith.constant 0 : i32
    %c0_i32_0 = arith.constant 0 : i32
    return %arg0, %c0_i32 : i32, i32
  }
}

module attributes {stable_mosaic.version = 11 : i64} {
  func.func @_matmul_bias_kernel(%arg0: i32, %arg1: i32, %arg2: i32, %arg3: memref<16x32xf32, #tpu.memory_space<vmem>>, %arg4: memref<32x64xbf16, #tpu.memory_space<vmem>>, %arg5: memref<1x64xf32, #tpu.memory_space<vmem>>, %arg6: memref<16x64xf32, #tpu.memory_space<vmem>>, %arg7: memref<16x64xf32, #tpu.memory_space<vmem>>) attributes {dimension_semantics = [#tpu.dimension_semantics<parallel>, #tpu.dimension_semantics<parallel>, #tpu.dimension_semantics<arbitrary>], iteration_bounds = array<i64: 1, 1, 1>, scalar_prefetch = 0 : i64, scratch_operands = 1 : i64, tpu.core_type = #tpu.core_type<tc>, window_params = [{transform_indices = @transform_0, window_bounds = array<i64: 16, 32>}, {transform_indices = @transform_1, window_bounds = array<i64: 32, 64>}, {transform_indices = @transform_2, window_bounds = array<i64: 1, 64>}, {transform_indices = @transform_3, window_bounds = array<i64: 16, 64>}]} {
    %c0_i32 = arith.constant 0 : i32
    %0 = arith.cmpi eq, %arg2, %c0_i32 : i32
    %1 = arith.extui %0 : i1 to i32
    %c0_i32_0 = arith.constant 0 : i32
    %2 = arith.cmpi ne, %1, %c0_i32_0 : i32
    scf.if %2 {
      %cst_10 = arith.constant 0.000000e+00 : f32
      %13 = vector.broadcast %cst_10 : f32 to vector<16x64xf32>
      %c0_11 = arith.constant 0 : index
      %c0_12 = arith.constant 0 : index
      %14 = vector.load %arg7[%c0_11, %c0_12] : memref<16x64xf32, #tpu.memory_space<vmem>>, vector<16x64xf32>
      tpu.vector_store %arg7[%c0_11, %c0_12], %13 {strides = array<i32>} : memref<16x64xf32, #tpu.memory_space<vmem>>, vector<16x64xf32>,
    } else {
    }
    %c0 = arith.constant 0 : index
    %c0_1 = arith.constant 0 : index
    %3 = vector.load %arg7[%c0, %c0_1] : memref<16x64xf32, #tpu.memory_space<vmem>>, vector<16x64xf32>
    %c0_2 = arith.constant 0 : index
    %c0_3 = arith.constant 0 : index
    %4 = vector.load %arg3[%c0_2, %c0_3] : memref<16x32xf32, #tpu.memory_space<vmem>>, vector<16x32xf32>
    %5 = arith.truncf %4 : vector<16x32xf32> to vector<16x32xbf16>
    %c0_4 = arith.constant 0 : index
    %c0_5 = arith.constant 0 : index
    %6 = vector.load %arg4[%c0_4, %c0_5] : memref<32x64xbf16, #tpu.memory_space<vmem>>, vector<32x64xbf16>
    %cst = arith.constant dense<0.000000e+00> : vector<16x64xf32>
    %7 = tpu.matmul %5, %6, %cst {dimension_numbers = #tpu.dot_dimension_numbers<[1], [0], [0], [1], [0, 0, 1, 1], [], []>} : vector<16x32xbf16>, vector<32x64xbf16>, vector<16x64xf32> -> vector<16x64xf32>
    %8 = arith.addf %3, %7 : vector<16x64xf32>
    %c0_6 = arith.constant 0 : index
    %c0_7 = arith.constant 0 : index
    %9 = vector.load %arg7[%c0_6, %c0_7] : memref<16x64xf32, #tpu.memory_space<vmem>>, vector<16x64xf32>
    tpu.vector_store %arg7[%c0_6, %c0_7], %8 {strides = array<i32>} : memref<16x64xf32, #tpu.memory_space<vmem>>, vector<16x64xf32>,
    %c0_i32_8 = arith.constant 0 : i32
    %10 = arith.cmpi eq, %arg2, %c0_i32_8 : i32
    %11 = arith.extui %10 : i1 to i32
    %c0_i32_9 = arith.constant 0 : i32
    %12 = arith.cmpi ne, %11, %c0_i32_9 : i32
    scf.if %12 {
      %c0_10 = arith.constant 0 : index
      %c0_11 = arith.constant 0 : index
      %13 = vector.load %arg7[%c0_10, %c0_11] : memref<16x64xf32, #tpu.memory_space<vmem>>, vector<16x64xf32>
      %c0_12 = arith.constant 0 : index
      %c0_13 = arith.constant 0 : index
      %14 = vector.load %arg5[%c0_12, %c0_13] : memref<1x64xf32, #tpu.memory_space<vmem>>, vector<1x64xf32>
      %15 = vector.broadcast %14 : vector<1x64xf32> to vector<16x64xf32>
      %16 = arith.addf %13, %15 : vector<16x64xf32>
      %c0_14 = arith.constant 0 : index
      %c0_15 = arith.constant 0 : index
      %17 = vector.load %arg6[%c0_14, %c0_15] : memref<16x64xf32, #tpu.memory_space<vmem>>, vector<16x64xf32>
      tpu.vector_store %arg6[%c0_14, %c0_15], %16 {strides = array<i32>} : memref<16x64xf32, #tpu.memory_space<vmem>>, vector<16x64xf32>,
    } else {
    }
    return
  }
  func.func @transform_0(%arg0: i32, %arg1: i32, %arg2: i32) -> (i32, i32) {
    %c0_i32 = arith.constant 0 : i32
    return %arg0, %arg2 : i32, i32
  }
  func.func @transform_1(%arg0: i32, %arg1: i32, %arg2: i32) -> (i32, i32) {
    %c0_i32 = arith.constant 0 : i32
    return %arg2, %arg1 : i32, i32
  }
  func.func @transform_2(%arg0: i32, %arg1: i32, %arg2: i32) -> (i32, i32) {
    %c0_i32 = arith.constant 0 : i32
    %c0_i32_0 = arith.constant 0 : i32
    return %c0_i32, %arg1 : i32, i32
  }
  func.func @transform_3(%arg0: i32, %arg1: i32, %arg2: i32) -> (i32, i32) {
    %c0_i32 = arith.constant 0 : i32
    return %arg0, %arg1 : i32, i32
  }
}

module attributes {stable_mosaic.version = 11 : i64} {
  func.func @_matmul_bias_kernel(%arg0: i32, %arg1: i32, %arg2: i32, %arg3: memref<16x32xf32, #tpu.memory_space<vmem>>, %arg4: memref<32x32xbf16, #tpu.memory_space<vmem>>, %arg5: memref<1x32xf32, #tpu.memory_space<vmem>>, %arg6: memref<16x32xf32, #tpu.memory_space<vmem>>, %arg7: memref<16x32xf32, #tpu.memory_space<vmem>>) attributes {dimension_semantics = [#tpu.dimension_semantics<parallel>, #tpu.dimension_semantics<parallel>, #tpu.dimension_semantics<arbitrary>], iteration_bounds = array<i64: 1, 1, 1>, scalar_prefetch = 0 : i64, scratch_operands = 1 : i64, tpu.core_type = #tpu.core_type<tc>, window_params = [{transform_indices = @transform_0, window_bounds = array<i64: 16, 32>}, {transform_indices = @transform_1, window_bounds = array<i64: 32, 32>}, {transform_indices = @transform_2, window_bounds = array<i64: 1, 32>}, {transform_indices = @transform_3, window_bounds = array<i64: 16, 32>}]} {
    %c0_i32 = arith.constant 0 : i32
    %0 = arith.cmpi eq, %arg2, %c0_i32 : i32
    %1 = arith.extui %0 : i1 to i32
    %c0_i32_0 = arith.constant 0 : i32
    %2 = arith.cmpi ne, %1, %c0_i32_0 : i32
    scf.if %2 {
      %cst_10 = arith.constant 0.000000e+00 : f32
      %13 = vector.broadcast %cst_10 : f32 to vector<16x32xf32>
      %c0_11 = arith.constant 0 : index
      %c0_12 = arith.constant 0 : index
      %14 = vector.load %arg7[%c0_11, %c0_12] : memref<16x32xf32, #tpu.memory_space<vmem>>, vector<16x32xf32>
      tpu.vector_store %arg7[%c0_11, %c0_12], %13 {strides = array<i32>} : memref<16x32xf32, #tpu.memory_space<vmem>>, vector<16x32xf32>,
    } else {
    }
    %c0 = arith.constant 0 : index
    %c0_1 = arith.constant 0 : index
    %3 = vector.load %arg7[%c0, %c0_1] : memref<16x32xf32, #tpu.memory_space<vmem>>, vector<16x32xf32>
    %c0_2 = arith.constant 0 : index
    %c0_3 = arith.constant 0 : index
    %4 = vector.load %arg3[%c0_2, %c0_3] : memref<16x32xf32, #tpu.memory_space<vmem>>, vector<16x32xf32>
    %5 = arith.truncf %4 : vector<16x32xf32> to vector<16x32xbf16>
    %c0_4 = arith.constant 0 : index
    %c0_5 = arith.constant 0 : index
    %6 = vector.load %arg4[%c0_4, %c0_5] : memref<32x32xbf16, #tpu.memory_space<vmem>>, vector<32x32xbf16>
    %cst = arith.constant dense<0.000000e+00> : vector<16x32xf32>
    %7 = tpu.matmul %5, %6, %cst {dimension_numbers = #tpu.dot_dimension_numbers<[1], [0], [0], [1], [0, 0, 1, 1], [], []>} : vector<16x32xbf16>, vector<32x32xbf16>, vector<16x32xf32> -> vector<16x32xf32>
    %8 = arith.addf %3, %7 : vector<16x32xf32>
    %c0_6 = arith.constant 0 : index
    %c0_7 = arith.constant 0 : index
    %9 = vector.load %arg7[%c0_6, %c0_7] : memref<16x32xf32, #tpu.memory_space<vmem>>, vector<16x32xf32>
    tpu.vector_store %arg7[%c0_6, %c0_7], %8 {strides = array<i32>} : memref<16x32xf32, #tpu.memory_space<vmem>>, vector<16x32xf32>,
    %c0_i32_8 = arith.constant 0 : i32
    %10 = arith.cmpi eq, %arg2, %c0_i32_8 : i32
    %11 = arith.extui %10 : i1 to i32
    %c0_i32_9 = arith.constant 0 : i32
    %12 = arith.cmpi ne, %11, %c0_i32_9 : i32
    scf.if %12 {
      %c0_10 = arith.constant 0 : index
      %c0_11 = arith.constant 0 : index
      %13 = vector.load %arg7[%c0_10, %c0_11] : memref<16x32xf32, #tpu.memory_space<vmem>>, vector<16x32xf32>
      %c0_12 = arith.constant 0 : index
      %c0_13 = arith.constant 0 : index
      %14 = vector.load %arg5[%c0_12, %c0_13] : memref<1x32xf32, #tpu.memory_space<vmem>>, vector<1x32xf32>
      %15 = vector.broadcast %14 : vector<1x32xf32> to vector<16x32xf32>
      %16 = arith.addf %13, %15 : vector<16x32xf32>
      %c0_14 = arith.constant 0 : index
      %c0_15 = arith.constant 0 : index
      %17 = vector.load %arg6[%c0_14, %c0_15] : memref<16x32xf32, #tpu.memory_space<vmem>>, vector<16x32xf32>
      tpu.vector_store %arg6[%c0_14, %c0_15], %16 {strides = array<i32>} : memref<16x32xf32, #tpu.memory_space<vmem>>, vector<16x32xf32>,
    } else {
    }
    return
  }
  func.func @transform_0(%arg0: i32, %arg1: i32, %arg2: i32) -> (i32, i32) {
    %c0_i32 = arith.constant 0 : i32
    return %arg0, %arg2 : i32, i32
  }
  func.func @transform_1(%arg0: i32, %arg1: i32, %arg2: i32) -> (i32, i32) {
    %c0_i32 = arith.constant 0 : i32
    return %arg2, %arg1 : i32, i32
  }
  func.func @transform_2(%arg0: i32, %arg1: i32, %arg2: i32) -> (i32, i32) {
    %c0_i32 = arith.constant 0 : i32
    %c0_i32_0 = arith.constant 0 : i32
    return %c0_i32, %arg1 : i32, i32
  }
  func.func @transform_3(%arg0: i32, %arg1: i32, %arg2: i32) -> (i32, i32) {
    %c0_i32 = arith.constant 0 : i32
    return %arg0, %arg1 : i32, i32
  }
}

module attributes {stable_mosaic.version = 11 : i64} {
  func.func @_cross_attn_kernel(%arg0: i32, %arg1: memref<1x8x32xf32, #tpu.memory_space<vmem>>, %arg2: memref<1x8x64xf32, #tpu.memory_space<vmem>>, %arg3: memref<1x8x8xi8, #tpu.memory_space<vmem>>, %arg4: memref<1x8x32xf32, #tpu.memory_space<vmem>>) attributes {dimension_semantics = [#tpu.dimension_semantics<parallel>], iteration_bounds = array<i64: 2>, scalar_prefetch = 0 : i64, scratch_operands = 0 : i64, tpu.core_type = #tpu.core_type<tc>, window_params = [{transform_indices = @transform_0, window_bounds = array<i64: 1, 8, 32>}, {transform_indices = @transform_1, window_bounds = array<i64: 1, 8, 64>}, {transform_indices = @transform_2, window_bounds = array<i64: 1, 8, 8>}, {transform_indices = @transform_3, window_bounds = array<i64: 1, 8, 32>}]} {
    %c0 = arith.constant 0 : index
    %c0_0 = arith.constant 0 : index
    %c0_1 = arith.constant 0 : index
    %0 = vector.load %arg3[%c0, %c0_0, %c0_1] : memref<1x8x8xi8, #tpu.memory_space<vmem>>, vector<1x8x8xi8>
    %1 = vector.shape_cast %0 : vector<1x8x8xi8> to vector<8x8xi8>
    %2 = arith.sitofp %1 : vector<8x8xi8> to vector<8x8xf32>
    %cst = arith.constant 1.000000e+00 : f32
    %3 = vector.broadcast %cst : f32 to vector<8x8xf32>
    %4 = arith.subf %3, %2 : vector<8x8xf32>
    %cst_2 = arith.constant -1.000000e+04 : f32
    %5 = vector.broadcast %cst_2 : f32 to vector<8x8xf32>
    %6 = arith.mulf %4, %5 : vector<8x8xf32>
    %c0_3 = arith.constant 0 : index
    %c0_4 = arith.constant 0 : index
    %c0_5 = arith.constant 0 : index
    %7 = vector.load %arg1[%c0_3, %c0_4, %c0_5] : memref<1x8x32xf32, #tpu.memory_space<vmem>>, vector<1x8x8xf32>
    %8 = vector.shape_cast %7 : vector<1x8x8xf32> to vector<8x8xf32>
    %9 = arith.truncf %8 : vector<8x8xf32> to vector<8x8xbf16>
    %c0_6 = arith.constant 0 : index
    %c0_7 = arith.constant 0 : index
    %c0_8 = arith.constant 0 : index
    %10 = vector.load %arg2[%c0_6, %c0_7, %c0_8] : memref<1x8x64xf32, #tpu.memory_space<vmem>>, vector<1x8x8xf32>
    %11 = vector.shape_cast %10 : vector<1x8x8xf32> to vector<8x8xf32>
    %12 = arith.truncf %11 : vector<8x8xf32> to vector<8x8xbf16>
    %c0_9 = arith.constant 0 : index
    %c0_10 = arith.constant 0 : index
    %c32 = arith.constant 32 : index
    %13 = vector.load %arg2[%c0_9, %c0_10, %c32] : memref<1x8x64xf32, #tpu.memory_space<vmem>>, vector<1x8x8xf32>
    %14 = vector.shape_cast %13 : vector<1x8x8xf32> to vector<8x8xf32>
    %15 = arith.truncf %14 : vector<8x8xf32> to vector<8x8xbf16>
    %cst_11 = arith.constant dense<0.000000e+00> : vector<8x8xf32>
    %16 = tpu.matmul %9, %12, %cst_11 {dimension_numbers = #tpu.dot_dimension_numbers<[1], [1], [0], [0], [0, 0, 1, 0], [], []>} : vector<8x8xbf16>, vector<8x8xbf16>, vector<8x8xf32> -> vector<8x8xf32>
    %17 = arith.addf %16, %6 : vector<8x8xf32>
    %cst_12 = arith.constant dense<0xFF800000> : vector<8xf32>
    %18 = vector.multi_reduction <maximumf>, %17, %cst_12 [1] : vector<8x8xf32> to vector<8xf32>
    %19 = vector.shape_cast %18 : vector<8xf32> to vector<8x1xf32>
    %20 = vector.broadcast %19 : vector<8x1xf32> to vector<8x8xf32>
    %21 = arith.subf %17, %20 : vector<8x8xf32>
    %22 = math.exp %21 : vector<8x8xf32>
    %cst_13 = arith.constant dense<0.000000e+00> : vector<8xf32>
    %23 = vector.multi_reduction <add>, %22, %cst_13 [1] : vector<8x8xf32> to vector<8xf32>
    %24 = vector.shape_cast %23 : vector<8xf32> to vector<8x1xf32>
    %25 = tpu.reciprocal %24 {approx = true} : vector<8x1xf32> -> vector<8x1xf32>
    %26 = vector.broadcast %25 : vector<8x1xf32> to vector<8x8xf32>
    %27 = arith.mulf %22, %26 : vector<8x8xf32>
    %28 = arith.truncf %27 : vector<8x8xf32> to vector<8x8xbf16>
    %cst_14 = arith.constant dense<0.000000e+00> : vector<8x8xf32>
    %29 = tpu.matmul %28, %15, %cst_14 {dimension_numbers = #tpu.dot_dimension_numbers<[1], [0], [0], [1], [0, 0, 1, 1], [], []>} : vector<8x8xbf16>, vector<8x8xbf16>, vector<8x8xf32> -> vector<8x8xf32>
    %c0_15 = arith.constant 0 : index
    %c0_16 = arith.constant 0 : index
    %c0_17 = arith.constant 0 : index
    %30 = vector.load %arg4[%c0_15, %c0_16, %c0_17] : memref<1x8x32xf32, #tpu.memory_space<vmem>>, vector<1x8x8xf32>
    %31 = vector.shape_cast %30 : vector<1x8x8xf32> to vector<8x8xf32>
    %32 = vector.shape_cast %29 : vector<8x8xf32> to vector<1x8x8xf32>
    tpu.vector_store %arg4[%c0_15, %c0_16, %c0_17], %32 {strides = array<i32>} : memref<1x8x32xf32, #tpu.memory_space<vmem>>, vector<1x8x8xf32>,
    %c0_18 = arith.constant 0 : index
    %c0_19 = arith.constant 0 : index
    %c8 = arith.constant 8 : index
    %33 = vector.load %arg1[%c0_18, %c0_19, %c8] : memref<1x8x32xf32, #tpu.memory_space<vmem>>, vector<1x8x8xf32>
    %34 = vector.shape_cast %33 : vector<1x8x8xf32> to vector<8x8xf32>
    %35 = arith.truncf %34 : vector<8x8xf32> to vector<8x8xbf16>
    %c0_20 = arith.constant 0 : index
    %c0_21 = arith.constant 0 : index
    %c8_22 = arith.constant 8 : index
    %36 = vector.load %arg2[%c0_20, %c0_21, %c8_22] : memref<1x8x64xf32, #tpu.memory_space<vmem>>, vector<1x8x8xf32>
    %37 = vector.shape_cast %36 : vector<1x8x8xf32> to vector<8x8xf32>
    %38 = arith.truncf %37 : vector<8x8xf32> to vector<8x8xbf16>
    %c0_23 = arith.constant 0 : index
    %c0_24 = arith.constant 0 : index
    %c40 = arith.constant 40 : index
    %39 = vector.load %arg2[%c0_23, %c0_24, %c40] : memref<1x8x64xf32, #tpu.memory_space<vmem>>, vector<1x8x8xf32>
    %40 = vector.shape_cast %39 : vector<1x8x8xf32> to vector<8x8xf32>
    %41 = arith.truncf %40 : vector<8x8xf32> to vector<8x8xbf16>
    %cst_25 = arith.constant dense<0.000000e+00> : vector<8x8xf32>
    %42 = tpu.matmul %35, %38, %cst_25 {dimension_numbers = #tpu.dot_dimension_numbers<[1], [1], [0], [0], [0, 0, 1, 0], [], []>} : vector<8x8xbf16>, vector<8x8xbf16>, vector<8x8xf32> -> vector<8x8xf32>
    %43 = arith.addf %42, %6 : vector<8x8xf32>
    %cst_26 = arith.constant dense<0xFF800000> : vector<8xf32>
    %44 = vector.multi_reduction <maximumf>, %43, %cst_26 [1] : vector<8x8xf32> to vector<8xf32>
    %45 = vector.shape_cast %44 : vector<8xf32> to vector<8x1xf32>
    %46 = vector.broadcast %45 : vector<8x1xf32> to vector<8x8xf32>
    %47 = arith.subf %43, %46 : vector<8x8xf32>
    %48 = math.exp %47 : vector<8x8xf32>
    %cst_27 = arith.constant dense<0.000000e+00> : vector<8xf32>
    %49 = vector.multi_reduction <add>, %48, %cst_27 [1] : vector<8x8xf32> to vector<8xf32>
    %50 = vector.shape_cast %49 : vector<8xf32> to vector<8x1xf32>
    %51 = tpu.reciprocal %50 {approx = true} : vector<8x1xf32> -> vector<8x1xf32>
    %52 = vector.broadcast %51 : vector<8x1xf32> to vector<8x8xf32>
    %53 = arith.mulf %48, %52 : vector<8x8xf32>
    %54 = arith.truncf %53 : vector<8x8xf32> to vector<8x8xbf16>
    %cst_28 = arith.constant dense<0.000000e+00> : vector<8x8xf32>
    %55 = tpu.matmul %54, %41, %cst_28 {dimension_numbers = #tpu.dot_dimension_numbers<[1], [0], [0], [1], [0, 0, 1, 1], [], []>} : vector<8x8xbf16>, vector<8x8xbf16>, vector<8x8xf32> -> vector<8x8xf32>
    %c0_29 = arith.constant 0 : index
    %c0_30 = arith.constant 0 : index
    %c8_31 = arith.constant 8 : index
    %56 = vector.load %arg4[%c0_29, %c0_30, %c8_31] : memref<1x8x32xf32, #tpu.memory_space<vmem>>, vector<1x8x8xf32>
    %57 = vector.shape_cast %56 : vector<1x8x8xf32> to vector<8x8xf32>
    %58 = vector.shape_cast %55 : vector<8x8xf32> to vector<1x8x8xf32>
    tpu.vector_store %arg4[%c0_29, %c0_30, %c8_31], %58 {strides = array<i32>} : memref<1x8x32xf32, #tpu.memory_space<vmem>>, vector<1x8x8xf32>,
    %c0_32 = arith.constant 0 : index
    %c0_33 = arith.constant 0 : index
    %c16 = arith.constant 16 : index
    %59 = vector.load %arg1[%c0_32, %c0_33, %c16] : memref<1x8x32xf32, #tpu.memory_space<vmem>>, vector<1x8x8xf32>
    %60 = vector.shape_cast %59 : vector<1x8x8xf32> to vector<8x8xf32>
    %61 = arith.truncf %60 : vector<8x8xf32> to vector<8x8xbf16>
    %c0_34 = arith.constant 0 : index
    %c0_35 = arith.constant 0 : index
    %c16_36 = arith.constant 16 : index
    %62 = vector.load %arg2[%c0_34, %c0_35, %c16_36] : memref<1x8x64xf32, #tpu.memory_space<vmem>>, vector<1x8x8xf32>
    %63 = vector.shape_cast %62 : vector<1x8x8xf32> to vector<8x8xf32>
    %64 = arith.truncf %63 : vector<8x8xf32> to vector<8x8xbf16>
    %c0_37 = arith.constant 0 : index
    %c0_38 = arith.constant 0 : index
    %c48 = arith.constant 48 : index
    %65 = vector.load %arg2[%c0_37, %c0_38, %c48] : memref<1x8x64xf32, #tpu.memory_space<vmem>>, vector<1x8x8xf32>
    %66 = vector.shape_cast %65 : vector<1x8x8xf32> to vector<8x8xf32>
    %67 = arith.truncf %66 : vector<8x8xf32> to vector<8x8xbf16>
    %cst_39 = arith.constant dense<0.000000e+00> : vector<8x8xf32>
    %68 = tpu.matmul %61, %64, %cst_39 {dimension_numbers = #tpu.dot_dimension_numbers<[1], [1], [0], [0], [0, 0, 1, 0], [], []>} : vector<8x8xbf16>, vector<8x8xbf16>, vector<8x8xf32> -> vector<8x8xf32>
    %69 = arith.addf %68, %6 : vector<8x8xf32>
    %cst_40 = arith.constant dense<0xFF800000> : vector<8xf32>
    %70 = vector.multi_reduction <maximumf>, %69, %cst_40 [1] : vector<8x8xf32> to vector<8xf32>
    %71 = vector.shape_cast %70 : vector<8xf32> to vector<8x1xf32>
    %72 = vector.broadcast %71 : vector<8x1xf32> to vector<8x8xf32>
    %73 = arith.subf %69, %72 : vector<8x8xf32>
    %74 = math.exp %73 : vector<8x8xf32>
    %cst_41 = arith.constant dense<0.000000e+00> : vector<8xf32>
    %75 = vector.multi_reduction <add>, %74, %cst_41 [1] : vector<8x8xf32> to vector<8xf32>
    %76 = vector.shape_cast %75 : vector<8xf32> to vector<8x1xf32>
    %77 = tpu.reciprocal %76 {approx = true} : vector<8x1xf32> -> vector<8x1xf32>
    %78 = vector.broadcast %77 : vector<8x1xf32> to vector<8x8xf32>
    %79 = arith.mulf %74, %78 : vector<8x8xf32>
    %80 = arith.truncf %79 : vector<8x8xf32> to vector<8x8xbf16>
    %cst_42 = arith.constant dense<0.000000e+00> : vector<8x8xf32>
    %81 = tpu.matmul %80, %67, %cst_42 {dimension_numbers = #tpu.dot_dimension_numbers<[1], [0], [0], [1], [0, 0, 1, 1], [], []>} : vector<8x8xbf16>, vector<8x8xbf16>, vector<8x8xf32> -> vector<8x8xf32>
    %c0_43 = arith.constant 0 : index
    %c0_44 = arith.constant 0 : index
    %c16_45 = arith.constant 16 : index
    %82 = vector.load %arg4[%c0_43, %c0_44, %c16_45] : memref<1x8x32xf32, #tpu.memory_space<vmem>>, vector<1x8x8xf32>
    %83 = vector.shape_cast %82 : vector<1x8x8xf32> to vector<8x8xf32>
    %84 = vector.shape_cast %81 : vector<8x8xf32> to vector<1x8x8xf32>
    tpu.vector_store %arg4[%c0_43, %c0_44, %c16_45], %84 {strides = array<i32>} : memref<1x8x32xf32, #tpu.memory_space<vmem>>, vector<1x8x8xf32>,
    %c0_46 = arith.constant 0 : index
    %c0_47 = arith.constant 0 : index
    %c24 = arith.constant 24 : index
    %85 = vector.load %arg1[%c0_46, %c0_47, %c24] : memref<1x8x32xf32, #tpu.memory_space<vmem>>, vector<1x8x8xf32>
    %86 = vector.shape_cast %85 : vector<1x8x8xf32> to vector<8x8xf32>
    %87 = arith.truncf %86 : vector<8x8xf32> to vector<8x8xbf16>
    %c0_48 = arith.constant 0 : index
    %c0_49 = arith.constant 0 : index
    %c24_50 = arith.constant 24 : index
    %88 = vector.load %arg2[%c0_48, %c0_49, %c24_50] : memref<1x8x64xf32, #tpu.memory_space<vmem>>, vector<1x8x8xf32>
    %89 = vector.shape_cast %88 : vector<1x8x8xf32> to vector<8x8xf32>
    %90 = arith.truncf %89 : vector<8x8xf32> to vector<8x8xbf16>
    %c0_51 = arith.constant 0 : index
    %c0_52 = arith.constant 0 : index
    %c56 = arith.constant 56 : index
    %91 = vector.load %arg2[%c0_51, %c0_52, %c56] : memref<1x8x64xf32, #tpu.memory_space<vmem>>, vector<1x8x8xf32>
    %92 = vector.shape_cast %91 : vector<1x8x8xf32> to vector<8x8xf32>
    %93 = arith.truncf %92 : vector<8x8xf32> to vector<8x8xbf16>
    %cst_53 = arith.constant dense<0.000000e+00> : vector<8x8xf32>
    %94 = tpu.matmul %87, %90, %cst_53 {dimension_numbers = #tpu.dot_dimension_numbers<[1], [1], [0], [0], [0, 0, 1, 0], [], []>} : vector<8x8xbf16>, vector<8x8xbf16>, vector<8x8xf32> -> vector<8x8xf32>
    %95 = arith.addf %94, %6 : vector<8x8xf32>
    %cst_54 = arith.constant dense<0xFF800000> : vector<8xf32>
    %96 = vector.multi_reduction <maximumf>, %95, %cst_54 [1] : vector<8x8xf32> to vector<8xf32>
    %97 = vector.shape_cast %96 : vector<8xf32> to vector<8x1xf32>
    %98 = vector.broadcast %97 : vector<8x1xf32> to vector<8x8xf32>
    %99 = arith.subf %95, %98 : vector<8x8xf32>
    %100 = math.exp %99 : vector<8x8xf32>
    %cst_55 = arith.constant dense<0.000000e+00> : vector<8xf32>
    %101 = vector.multi_reduction <add>, %100, %cst_55 [1] : vector<8x8xf32> to vector<8xf32>
    %102 = vector.shape_cast %101 : vector<8xf32> to vector<8x1xf32>
    %103 = tpu.reciprocal %102 {approx = true} : vector<8x1xf32> -> vector<8x1xf32>
    %104 = vector.broadcast %103 : vector<8x1xf32> to vector<8x8xf32>
    %105 = arith.mulf %100, %104 : vector<8x8xf32>
    %106 = arith.truncf %105 : vector<8x8xf32> to vector<8x8xbf16>
    %cst_56 = arith.constant dense<0.000000e+00> : vector<8x8xf32>
    %107 = tpu.matmul %106, %93, %cst_56 {dimension_numbers = #tpu.dot_dimension_numbers<[1], [0], [0], [1], [0, 0, 1, 1], [], []>} : vector<8x8xbf16>, vector<8x8xbf16>, vector<8x8xf32> -> vector<8x8xf32>
    %c0_57 = arith.constant 0 : index
    %c0_58 = arith.constant 0 : index
    %c24_59 = arith.constant 24 : index
    %108 = vector.load %arg4[%c0_57, %c0_58, %c24_59] : memref<1x8x32xf32, #tpu.memory_space<vmem>>, vector<1x8x8xf32>
    %109 = vector.shape_cast %108 : vector<1x8x8xf32> to vector<8x8xf32>
    %110 = vector.shape_cast %107 : vector<8x8xf32> to vector<1x8x8xf32>
    tpu.vector_store %arg4[%c0_57, %c0_58, %c24_59], %110 {strides = array<i32>} : memref<1x8x32xf32, #tpu.memory_space<vmem>>, vector<1x8x8xf32>,
    return
  }
  func.func @transform_0(%arg0: i32) -> (i32, i32, i32) {
    %c0_i32 = arith.constant 0 : i32
    %c0_i32_0 = arith.constant 0 : i32
    %c0_i32_1 = arith.constant 0 : i32
    return %arg0, %c0_i32, %c0_i32_0 : i32, i32, i32
  }
  func.func @transform_1(%arg0: i32) -> (i32, i32, i32) {
    %c0_i32 = arith.constant 0 : i32
    %c0_i32_0 = arith.constant 0 : i32
    %c0_i32_1 = arith.constant 0 : i32
    return %arg0, %c0_i32, %c0_i32_0 : i32, i32, i32
  }
  func.func @transform_2(%arg0: i32) -> (i32, i32, i32) {
    %c0_i32 = arith.constant 0 : i32
    %c0_i32_0 = arith.constant 0 : i32
    %c0_i32_1 = arith.constant 0 : i32
    return %arg0, %c0_i32, %c0_i32_0 : i32, i32, i32
  }
  func.func @transform_3(%arg0: i32) -> (i32, i32, i32) {
    %c0_i32 = arith.constant 0 : i32
    %c0_i32_0 = arith.constant 0 : i32
    %c0_i32_1 = arith.constant 0 : i32
    return %arg0, %c0_i32, %c0_i32_0 : i32, i32, i32
  }
}

module attributes {stable_mosaic.version = 11 : i64} {
  func.func @_matmul_kernel(%arg0: i32, %arg1: i32, %arg2: i32, %arg3: memref<16x32xf32, #tpu.memory_space<vmem>>, %arg4: memref<32x16xbf16, #tpu.memory_space<vmem>>, %arg5: memref<16x16xf32, #tpu.memory_space<vmem>>, %arg6: memref<16x16xf32, #tpu.memory_space<vmem>>) attributes {dimension_semantics = [#tpu.dimension_semantics<parallel>, #tpu.dimension_semantics<parallel>, #tpu.dimension_semantics<arbitrary>], iteration_bounds = array<i64: 1, 1, 1>, scalar_prefetch = 0 : i64, scratch_operands = 1 : i64, tpu.core_type = #tpu.core_type<tc>, window_params = [{transform_indices = @transform_0, window_bounds = array<i64: 16, 32>}, {transform_indices = @transform_1, window_bounds = array<i64: 32, 16>}, {transform_indices = @transform_2, window_bounds = array<i64: 16, 16>}]} {
    %c0_i32 = arith.constant 0 : i32
    %0 = arith.cmpi eq, %arg2, %c0_i32 : i32
    %1 = arith.extui %0 : i1 to i32
    %c0_i32_0 = arith.constant 0 : i32
    %2 = arith.cmpi ne, %1, %c0_i32_0 : i32
    scf.if %2 {
      %cst_10 = arith.constant 0.000000e+00 : f32
      %13 = vector.broadcast %cst_10 : f32 to vector<16x16xf32>
      %c0_11 = arith.constant 0 : index
      %c0_12 = arith.constant 0 : index
      %14 = vector.load %arg6[%c0_11, %c0_12] : memref<16x16xf32, #tpu.memory_space<vmem>>, vector<16x16xf32>
      tpu.vector_store %arg6[%c0_11, %c0_12], %13 {strides = array<i32>} : memref<16x16xf32, #tpu.memory_space<vmem>>, vector<16x16xf32>,
    } else {
    }
    %c0 = arith.constant 0 : index
    %c0_1 = arith.constant 0 : index
    %3 = vector.load %arg6[%c0, %c0_1] : memref<16x16xf32, #tpu.memory_space<vmem>>, vector<16x16xf32>
    %c0_2 = arith.constant 0 : index
    %c0_3 = arith.constant 0 : index
    %4 = vector.load %arg3[%c0_2, %c0_3] : memref<16x32xf32, #tpu.memory_space<vmem>>, vector<16x32xf32>
    %5 = arith.truncf %4 : vector<16x32xf32> to vector<16x32xbf16>
    %c0_4 = arith.constant 0 : index
    %c0_5 = arith.constant 0 : index
    %6 = vector.load %arg4[%c0_4, %c0_5] : memref<32x16xbf16, #tpu.memory_space<vmem>>, vector<32x16xbf16>
    %cst = arith.constant dense<0.000000e+00> : vector<16x16xf32>
    %7 = tpu.matmul %5, %6, %cst {dimension_numbers = #tpu.dot_dimension_numbers<[1], [0], [0], [1], [0, 0, 1, 1], [], []>} : vector<16x32xbf16>, vector<32x16xbf16>, vector<16x16xf32> -> vector<16x16xf32>
    %8 = arith.addf %3, %7 : vector<16x16xf32>
    %c0_6 = arith.constant 0 : index
    %c0_7 = arith.constant 0 : index
    %9 = vector.load %arg6[%c0_6, %c0_7] : memref<16x16xf32, #tpu.memory_space<vmem>>, vector<16x16xf32>
    tpu.vector_store %arg6[%c0_6, %c0_7], %8 {strides = array<i32>} : memref<16x16xf32, #tpu.memory_space<vmem>>, vector<16x16xf32>,
    %c0_i32_8 = arith.constant 0 : i32
    %10 = arith.cmpi eq, %arg2, %c0_i32_8 : i32
    %11 = arith.extui %10 : i1 to i32
    %c0_i32_9 = arith.constant 0 : i32
    %12 = arith.cmpi ne, %11, %c0_i32_9 : i32
    scf.if %12 {
      %c0_10 = arith.constant 0 : index
      %c0_11 = arith.constant 0 : index
      %13 = vector.load %arg6[%c0_10, %c0_11] : memref<16x16xf32, #tpu.memory_space<vmem>>, vector<16x16xf32>
      %c0_12 = arith.constant 0 : index
      %c0_13 = arith.constant 0 : index
      %14 = vector.load %arg5[%c0_12, %c0_13] : memref<16x16xf32, #tpu.memory_space<vmem>>, vector<16x16xf32>
      tpu.vector_store %arg5[%c0_12, %c0_13], %13 {strides = array<i32>} : memref<16x16xf32, #tpu.memory_space<vmem>>, vector<16x16xf32>,
    } else {
    }
    return
  }
  func.func @transform_0(%arg0: i32, %arg1: i32, %arg2: i32) -> (i32, i32) {
    %c0_i32 = arith.constant 0 : i32
    return %arg0, %arg2 : i32, i32
  }
  func.func @transform_1(%arg0: i32, %arg1: i32, %arg2: i32) -> (i32, i32) {
    %c0_i32 = arith.constant 0 : i32
    return %arg2, %arg1 : i32, i32
  }
  func.func @transform_2(%arg0: i32, %arg1: i32, %arg2: i32) -> (i32, i32) {
    %c0_i32 = arith.constant 0 : i32
    return %arg0, %arg1 : i32, i32
  }
}

</mosaic_0001>

<bundles_post_ra>
// kernel: forward_transformer.25
= control target key start
LH: loop header
LB: loop body
LE: loop exit
PB: predicated region body
PF: predicated region fallthrough
CT: control target
= control target key end

     0   :  { %vm19_vm0 = vcmask 785408   ;;  %v132_v0 = vmov 0.0   ;;  %vm133_vm1 = vmmov 0   ;;  %vm43_vm2 = vcmask 261120   ;;  %s181_s1 = inlined_call_operand.vmem [shape: bf16[32,96], index: 1, kind: input, shape index: {}]   ;;  %s182_s0 = inlined_call_operand.vmem [shape: f32[16,32], index: 0, kind: input, shape index: {}]   ;;  %s183_s2 = inlined_call_operand.vmem [shape: f32[1,96], index: 2, kind: input, shape index: {}]   ;;  %s184_s3 = inlined_call_operand.vmem [shape: f32[16,96], index: 3, kind: output, shape index: {}]  }
   0x1   :  { %120 = vmatprep.subr.bf16.mxu0 %v132_v0  ;;  %v130_v1 = vld [vmem:[%s181_s1] sm:$0xff]   ;;  %124 = vmatprep.mubr.msk.bf16.mxu0 %vm133_vm1, %v132_v0  ;;  %20 = vst.msk [vmem:[#allocation2] sm:$0xff] %vm19_vm0, %v132_v0  ;;  %21 = vst.msk [vmem:[#allocation2 + $0x8] sm:$0xff] %vm19_vm0, %v132_v0  ;;  %v131_v2 = vld [vmem:[%s181_s1 + $0x8] sm:$0xff]  }
   0x2   :  { %121 = vmatpush3.bf16.msra.mxu0 %v130_v1  ;;  %v24_v3 = vld [vmem:[%s182_s0] sm:$0xff]  ;;  %v25_v4 = vld [vmem:[%s182_s0 + $0x8] sm:$0xff] }
   0x3   :  { %122 = vmatprep.subr.bf16.mxu0 %v132_v0  ;;  %v26_v5 = vpack.c.bf16 %v25_v4, %v24_v3  ;;  %v116_v14 = vld [vmem:[%s183_s2] ss:$0 sm:$0xff] }
   0x6   :  { %123 = vmatpush3.bf16.msra.mxu0 %v131_v2 }
   0x8   :  { %v22_v6 = vld [vmem:[#allocation2] sm:$0xff]  ;;  %v23_v8 = vld [vmem:[#allocation2 + $0x8] sm:$0xff] }
   0x9   :  { %125 = vmatmul.mubr.msk.bf16.vlgmr.msra.gmra.mrb[0].mxu0 %vm43_vm2, %v26_v5 }
  0xdc   :  { %v81_v7 = vpop.f32.mrb[0].mxu0 }
  0xdd   :  { %v88_v9 = vadd.f32 %v81_v7, %v22_v6  ;;  %v126_v10 = vpop.f32.mrb[1].mxu0 }
  0xde   :  { %v84_v11 = vpop.f32.mrb[2].mxu0 }
  0xdf   :  { %91 = vst.msk [vmem:[#allocation2] sm:$0xff] %vm19_vm0, %v88_v9  ;;  %v89_v12 = vadd.f32 %v84_v11, %v23_v8  ;;  %v127_v13 = vpop.f32.mrb[3].mxu0 }
  0xe1   :  { %92 = vst.msk [vmem:[#allocation2 + $0x8] sm:$0xff] %vm19_vm0, %v89_v12 }
  0xe6   :  { %v96_v15 = vld [vmem:[#allocation2] sm:$0xff] }
  0xe7   :  { %v105_v16 = vadd.f32 %v116_v14, %v96_v15 }
  0xe8   :  { %v97_v17 = vld [vmem:[#allocation2 + $0x8] sm:$0xff] }
  0xe9   :  { %107 = vst.msk [vmem:[%s184_s3] sm:$0xff] %vm19_vm0, %v105_v16  ;;  %v106_v18 = vadd.f32 %v116_v14, %v97_v17 }
  0xeb   :  { %108 = vst.msk [vmem:[%s184_s3 + $0x8] sm:$0xff] %vm19_vm0, %v106_v18 }

// kernel: forward_transformer.27
= control target key start
LH: loop header
LB: loop body
LE: loop exit
PB: predicated region body
PF: predicated region fallthrough
CT: control target
= control target key end

     0   :  { %s518_s21 = smov 0   ;;  %s562_s0 = inlined_call_operand.vmem [shape: f32[16,32], index: 0, kind: input, shape index: {}]   ;;  %s563_s1 = inlined_call_operand.vmem [shape: bf16[32,32], index: 1, kind: input, shape index: {}]   ;;  %s564_s2 = inlined_call_operand.vmem [shape: f32[1,32], index: 2, kind: input, shape index: {}]   ;;  %s565_s3 = inlined_call_operand.vmem [shape: f32[16,32], index: 3, kind: input, shape index: {}]   ;;  %s566_s4 = inlined_call_operand.vmem [shape: f32[1,32], index: 4, kind: input, shape index: {}]   ;;  %s567_s5 = inlined_call_operand.vmem [shape: f32[1,32], index: 5, kind: input, shape index: {}]   ;;  %s568_s6 = inlined_call_operand.vmem [shape: f32[16,32], index: 6, kind: output, shape index: {}]  }
   0x1 LB: > { %s432_s22 = sadd.s32 4294967295, %s479_s21   ;;  %p436_p0 = scmp.ge.s32.totalorder %s479_s21, 1  ;;  %s479_s21 = sphi %s518_s21, %s16_s21  }
   0x2   : > { %p220_p1 = scmp.lt.s32.totalorder %s479_s21, 3 }
   0x4   : > { %p221_p2 = pnand %p436_p0, %p220_p1 }
   0x5   : > { %v469_v0 = vld [vmem:[%s563_s1] sm:$0xff] (!%p221_p2)   ;;  %v481_v1 = vmov (!%p221_p2), 0.0   ;;  %v470_v2 = vld [vmem:[%s563_s1 + $0x8] sm:$0xff] (!%p221_p2)   ;;  %vm482_vm0 = vmmov (!%p221_p2), 0   ;;  %p252_p3 = scmp.lt.s32.totalorder (!%p221_p2), %s432_s22, 1  ;;  %vm290_vm1 = vcmask (!%p221_p2), 261120  }
   0x6   : > { %224 = sbr.rel (%p221_p2) target bundleno = 549 (0x225), region = 44  ;;  %451 = vmatprep.subr.bf16.mxu0 (!%p221_p2), %v481_v1  ;;  %455 = vmatprep.mubr.msk.bf16.mxu0 (!%p221_p2), %vm482_vm0, %v481_v1  ;;  %v440_v5 = vld [vmem:[%s564_s2] ss:$0 sm:$0xff] (!%p221_p2) }
   0x7   : > { %452 = vmatpush3.bf16.msra.mxu0 (!%p221_p2), %v469_v0  ;;  %v444_v23 = vld [vmem:[%s566_s4] ss:$0 sm:$0xff] (!%p221_p2) }
   0x8   : > { %453 = vmatprep.subr.bf16.mxu0 (!%p221_p2), %v481_v1  ;;  %v445_v25 = vld [vmem:[%s567_s5] ss:$0 sm:$0xff] (!%p221_p2) }
   0xb   : > { %454 = vmatpush3.bf16.msra.mxu0 (!%p221_p2), %v470_v2 }
   0xd   : > { %s570_s22 = smov (!%p252_p3, %s432_s22), 1 }
   0xe   : > { %s532_s27 = sshll.u32 %s570_s22, 3 }
   0xf   : > { %s255_s30 = scalar_lea.vmem %s562_s0, %s532_s27  ;;  %s259_s9 = scalar_lea.vmem %s565_s3, %s532_s27 }
  0x10   : > { %v265_v3 = vld [vmem:[%s255_s30] sm:$0xff]  ;;  %s263_s18 = scalar_lea.vmem %s568_s6, %s532_s27 }
  0x11   : > { %v266_v4 = vpack.c.bf16 %v265_v3, %v265_v3  ;;  %v334_v7 = vld [vmem:[%s259_s9] sm:$0xff] }
  0x13   : > { %456 = vmatmul.mubr.msk.bf16.vlgmr.msra.gmra.mrb[0].mxu0 %vm290_vm1, %v266_v4 }
  0xe6   : > { %v328_v6 = vpop.f32.mrb[0].mxu0 }
  0xe7   : > { %v329_v8 = vadd.f32 %v440_v5, %v328_v6  ;;  %v457_v9 = vpop.f32.mrb[1].mxu0 }
  0xe8   : > { %v331_v10 = vpop.f32.mrb[2].mxu0 }
  0xe9   : > { %v458_v11 = vpop.f32.mrb[3].mxu0  ;;  %v335_v12 = vadd.f32 %v334_v7, %v329_v8 }
  0xeb   : > { %v338_v13 = vsel %vm290_vm1, %v335_v12, 0.0 }
  0xec   : > { %339 = vadd.xlane.f32.xlu0 %v338_v13 }
 0x179   : > { %v340_v14 = vpop.xlane.xlu0 %339 }
 0x17a   : > { %v342_v15 = vmul.f32 0.03125, %v340_v14 }
 0x17c   : > { %v343_v16 = vsub.f32 %v335_v12, %v342_v15 }
 0x17e   : > { %v344_v17 = vmul.f32 %v343_v16, %v343_v16 }
 0x180   : > { %v345_v18 = vsel %vm290_vm1, %v344_v17, 0.0 }
 0x181   : > { %346 = vadd.xlane.f32.xlu0 %v345_v18 }
 0x20e   : > { %v347_v19 = vpop.xlane.xlu0 %346 }
 0x20f   : > { %v348_v20 = vmul.f32 0.03125, %v347_v19 }
 0x211   : > { %v349_v21 = vadd.f32 1e-12, %v348_v20 }
 0x213   : > { %471 = vrsqrt.f32 %v349_v21 }
 0x21d   : > { %v472_v22 = vpop.eup %471 }
 0x21e   : > { %v351_v24 = vmul.f32 %v472_v22, %v343_v16 }
 0x220   : > { %v358_v26 = vmul.f32 %v444_v23, %v351_v24 }
 0x222   : > { %v365_v27 = vadd.f32 %v445_v25, %v358_v26 }
 0x224   : > { %366 = vst.msk [vmem:[%s263_s18] sm:$0xff] %vm290_vm1, %v365_v27 }
 0x225 PF: > { %s16_s21 = sadd.s32 1, %s479_s21  }
 0x226   : > { %p13_p4 = scmp.ge.s32.totalorder %s16_s21, 4  }
 0x228   :  { %15 = sbr.rel (!%p13_p4) target bundleno = 1 (0x1), region = 77 }

// kernel: forward_transformer.28
= control target key start
LH: loop header
LB: loop body
LE: loop exit
PB: predicated region body
PF: predicated region fallthrough
CT: control target
= control target key end

     0   :  { %s631_s24 = smov 0   ;;  %s689_s0 = inlined_call_operand.vmem [shape: f32[16,32], index: 0, kind: input, shape index: {}]   ;;  %s690_s1 = inlined_call_operand.vmem [shape: bf16[32,64], index: 1, kind: input, shape index: {}]   ;;  %s691_s2 = inlined_call_operand.vmem [shape: f32[1,64], index: 2, kind: input, shape index: {}]   ;;  %s692_s3 = inlined_call_operand.vmem [shape: bf16[64,32], index: 3, kind: input, shape index: {}]   ;;  %s693_s4 = inlined_call_operand.vmem [shape: f32[1,32], index: 4, kind: input, shape index: {}]   ;;  %s694_s5 = inlined_call_operand.vmem [shape: f32[1,32], index: 5, kind: input, shape index: {}]   ;;  %s695_s6 = inlined_call_operand.vmem [shape: f32[1,32], index: 6, kind: input, shape index: {}]   ;;  %s696_s7 = inlined_call_operand.vmem [shape: f32[16,32], index: 7, kind: output, shape index: {}]  }
   0x1 LB: > { %s514_s25 = sadd.s32 4294967295, %s587_s24   ;;  %p518_p0 = scmp.ge.s32.totalorder %s587_s24, 1  ;;  %s587_s24 = sphi %s631_s24, %s17_s24  }
   0x2   : > { %p236_p1 = scmp.lt.s32.totalorder %s587_s24, 3 }
   0x4   : > { %p237_p2 = pnand %p518_p0, %p236_p1 }
   0x5   : > { %v573_v0 = vld [vmem:[%s690_s1] sm:$0xff] (!%p237_p2)   ;;  %v589_v1 = vmov (!%p237_p2), 0.0   ;;  %v574_v2 = vld [vmem:[%s690_s1 + $0x8] sm:$0xff] (!%p237_p2)   ;;  %vm590_vm0 = vmmov (!%p237_p2), 0   ;;  %p266_p3 = scmp.lt.s32.totalorder (!%p237_p2), %s514_s25, 1  ;;  %vm300_vm1 = vcmask (!%p237_p2), 261120  }
   0x6   : > { %240 = sbr.rel (%p237_p2) target bundleno = 767 (0x2ff), region = 48  ;;  %543 = vmatprep.subr.bf16.mxu0 (!%p237_p2), %v589_v1  ;;  %551 = vmatprep.subr.bf16.mxu1 (!%p237_p2), %v589_v1  ;;  %v575_v3 = vld [vmem:[%s692_s3] sm:$0xff] (!%p237_p2)   ;;  %v576_v4 = vld [vmem:[%s692_s3 + $0x8] sm:$0xff] (!%p237_p2)   ;;  %v577_v7 = vld [vmem:[%s692_s3 + $0x10] sm:$0xff] (!%p237_p2)   ;;  %vm385_vm2 = vcmask (!%p237_p2), 523264  }
   0x7   : > { %544 = vmatpush3.bf16.msra.mxu0 (!%p237_p2), %v573_v0  ;;  %547 = vmatprep.mubr.msk.bf16.mxu0 (!%p237_p2), %vm590_vm0, %v589_v1  ;;  %v578_v8 = vld [vmem:[%s692_s3 + $0x18] sm:$0xff] (!%p237_p2)   ;;  %v521_v9 = vld [vmem:[%s691_s2] ss:$0 sm:$0xff] (!%p237_p2) }
   0x8   : > { %545 = vmatprep.subr.bf16.mxu0 (!%p237_p2), %v589_v1  ;;  %559 = vmatprep.mubr.msk.bf16.mxu1 (!%p237_p2), %vm590_vm0, %v589_v1  ;;  %v525_v17 = vld [vmem:[%s693_s4] ss:$0 sm:$0xff] (!%p237_p2) }
   0x9   : > { %552 = vmatpush3.bf16.msra.mxu1 (!%p237_p2), %v575_v3  ;;  %v531_v34 = vld [vmem:[%s694_s5] ss:$0 sm:$0xff] (!%p237_p2) }
   0xa   : > { %553 = vmatprep.subr.bf16.mxu1 (!%p237_p2), %v589_v1  ;;  %v532_v36 = vld [vmem:[%s695_s6] ss:$0 sm:$0xff] (!%p237_p2) }
   0xb   : > { %546 = vmatpush3.bf16.msra.mxu0 (!%p237_p2), %v574_v2 }
   0xd   : > { %s698_s25 = smov (!%p266_p3, %s514_s25), 1  ;;  %554 = vmatpush3.bf16.msra.mxu1 %v576_v4 }
   0xe   : > { %s519_s11 = sshll.u32 %s698_s25, 3  ;;  %555 = vmatprep.subr.bf16.mxu1 %v589_v1 }
   0xf   : > { %s269_s14 = scalar_lea.vmem %s689_s0, %s519_s11  ;;  %s273_s8 = scalar_lea.vmem %s696_s7, %s519_s11 }
  0x10   : > { %v275_v5 = vld [vmem:[%s269_s14] sm:$0xff] }
  0x11   : > { %v276_v6 = vpack.c.bf16 %v275_v5, %v275_v5  ;;  %556 = vmatpush3.bf16.msra.mxu1 %v577_v7 }
  0x12   : > { %557 = vmatprep.subr.bf16.mxu1 %v589_v1 }
  0x13   : > { %548 = vmatmul.mubr.msk.bf16.vlgmr.msra.gmra.mrb[0].mxu0 %vm300_vm1, %v276_v6 }
  0x15   : > { %558 = vmatpush3.bf16.msra.mxu1 %v578_v8 }
  0xe6   : > { %v338_v10 = vpop.f32.mrb[0].mxu0 }
  0xe7   : > { %v339_v11 = vadd.f32 %v521_v9, %v338_v10  ;;  %v549_v12 = vpop.f32.mrb[1].mxu0 }
  0xe8   : > { %v341_v13 = vpop.f32.mrb[2].mxu0 }
  0xe9   : > { %v344_v14 = vmax.f32 %v339_v11, 0.0  ;;  %v550_v15 = vpop.f32.mrb[3].mxu0 }
  0xeb   : > { %v345_v16 = vpack.c.bf16 %v344_v14, %v344_v14 }
  0xed   : > { %560 = vmatmul.mubr.msk.bf16.vlgmr.msra.gmra.mrb[0].mxu1 %vm385_vm2, %v345_v16 }
 0x1c0   : > { %v423_v18 = vpop.f32.mrb[0].mxu1 }
 0x1c1   : > { %v424_v19 = vadd.f32 %v525_v17, %v423_v18  ;;  %v561_v20 = vpop.f32.mrb[1].mxu1 }
 0x1c2   : > { %v426_v21 = vpop.f32.mrb[2].mxu1 }
 0x1c3   : > { %v562_v22 = vpop.f32.mrb[3].mxu1  ;;  %v429_v23 = vadd.f32 %v424_v19, %v275_v5 }
 0x1c5   : > { %v432_v24 = vsel %vm300_vm1, %v429_v23, 0.0 }
 0x1c6   : > { %433 = vadd.xlane.f32.xlu0 %v432_v24 }
 0x253   : > { %v434_v25 = vpop.xlane.xlu0 %433 }
 0x254   : > { %v436_v26 = vmul.f32 0.03125, %v434_v25 }
 0x256   : > { %v437_v27 = vsub.f32 %v429_v23, %v436_v26 }
 0x258   : > { %v438_v28 = vmul.f32 %v437_v27, %v437_v27 }
 0x25a   : > { %v439_v29 = vsel %vm300_vm1, %v438_v28, 0.0 }
 0x25b   : > { %440 = vadd.xlane.f32.xlu0 %v439_v29 }
 0x2e8   : > { %v441_v30 = vpop.xlane.xlu0 %440 }
 0x2e9   : > { %v442_v31 = vmul.f32 0.03125, %v441_v30 }
 0x2eb   : > { %v443_v32 = vadd.f32 1e-12, %v442_v31 }
 0x2ed   : > { %579 = vrsqrt.f32 %v443_v32 }
 0x2f7   : > { %v580_v33 = vpop.eup %579 }
 0x2f8   : > { %v445_v35 = vmul.f32 %v580_v33, %v437_v27 }
 0x2fa   : > { %v452_v37 = vmul.f32 %v531_v34, %v445_v35 }
 0x2fc   : > { %v459_v38 = vadd.f32 %v532_v36, %v452_v37 }
 0x2fe   : > { %460 = vst.msk [vmem:[%s273_s8] sm:$0xff] %vm300_vm1, %v459_v38 }
 0x2ff PF: > { %s17_s24 = sadd.s32 1, %s587_s24  }
 0x300   : > { %p14_p4 = scmp.ge.s32.totalorder %s17_s24, 4  }
 0x302   :  { %16 = sbr.rel (!%p14_p4) target bundleno = 1 (0x1), region = 78 }

// kernel: forward_transformer.26
= control target key start
LH: loop header
LB: loop body
LE: loop exit
PB: predicated region body
PF: predicated region fallthrough
CT: control target
= control target key end

     0   :  { %s859_s9 = smov 0   ;;  %s962_s0 = inlined_call_operand.vmem [shape: f32[2,8,96], index: 0, kind: input, shape index: {}]   ;;  %s963_s1 = inlined_call_operand.vmem [shape: s8[2,8,8], index: 1, kind: input, shape index: {}]   ;;  %s964_s2 = inlined_call_operand.vmem [shape: f32[2,8,32], index: 2, kind: output, shape index: {}]  }
   0x1 LB: > { %s698_s10 = sadd.s32 4294967295, %s826_s9   ;;  %p702_p0 = scmp.ge.s32.totalorder %s826_s9, 1  ;;  %s826_s9 = sphi %s859_s9, %s12_s9  }
   0x2   : > { %p120_p1 = scmp.lt.s32.totalorder %s826_s9, 3 }
   0x4   : > { %p121_p2 = pnand %p702_p0, %p120_p1 }
   0x5   : > { %p144_p3 = scmp.lt.s32.totalorder (!%p121_p2), %s698_s10, 1  ;;  %v828_v0 = vmov (!%p121_p2), 0.0   ;;  %vm829_vm0 = vmmov (!%p121_p2), 0   ;;  %s830_s15 = smov (!%p121_p2), 96   ;;  %vm167_vm1 = vcmask (!%p121_p2), 64512   ;;  %vm231_vm2 = vcmask (!%p121_p2), 1043456  }
   0x6   : > { %124 = sbr.rel (%p121_p2) target bundleno = 1599 (0x63f), region = 28  ;;  %732 = vmatprep.subr.bf16.mxu0 (!%p121_p2), %v828_v0  ;;  %734 = vmatprep.mubr.msk.bf16.mxu0 (!%p121_p2), %vm829_vm0, %v828_v0  ;;  %s831_s16 = smov (!%p121_p2), 64   ;;  %vm393_vm3 = vcmask (!%p121_p2), 130112   ;;  %vm512_vm4 = vcmask (!%p121_p2), 195712   ;;  %vm631_vm5 = vcmask (!%p121_p2), 261312  }
   0x7   : > { %738 = vmatprep.subr.bf16.mxu1 (!%p121_p2), %v828_v0  ;;  %740 = vmatprep.mubr.msk.bf16.mxu1 (!%p121_p2), %vm829_vm0, %v828_v0  ;;  %s832_s17 = smov (!%p121_p2), 88   ;;  %s833_s22 = smov (!%p121_p2), 72  }
   0x8   : > { %s834_s23 = smov (!%p121_p2), 120   ;;  %s835_s24 = smov (!%p121_p2), 80  }
   0x9   : > { %s836_s25 = smov (!%p121_p2), 112   ;;  %s837_s26 = smov (!%p121_p2), 104  }
   0xa   : > { %s838_s30 = smov (!%p121_p2), 56   ;;  %s839_s3 = smov (!%p121_p2), 48  }
   0xb   : > { %s840_s4 = smov (!%p121_p2), 40   ;;  %s841_s5 = smov (!%p121_p2), 8  }
   0xc   : > { %s842_s6 = smov (!%p121_p2), 16   ;;  %s843_s7 = smov (!%p121_p2), 24  }
   0xd   : > { %s966_s10 = smov (!%p144_p3, %s698_s10), 1 }
   0xe   : > { %s703_s11 = sshll.u32 %s966_s10, 3  ;;  %s704_s18 = sshll.u32 %s966_s10, 1 }
   0xf   : > { %s147_s14 = scalar_lea.vmem %s962_s0, %s703_s11  ;;  %s151_s21 = scalar_lea.vmem %s963_s1, %s704_s18 }
  0x10   : > { %v162_v1 = vld [vmem:[%s147_s14] sm:$0xff]  ;;  %s928_s29 = scalar_lea.vmem %s964_s2, %s703_s11 }
  0x11   : > { %v881_v2 = vpack.c.bf16 %v162_v1, %v162_v1  ;;  %v157_v5 = vld [vmem:[%s151_s21] sm:$0x3] }
  0x12   : > { %v158_v6 = vunpack.c.0.s8 %v157_v5 }
  0x13   : > { %165 = vrot.lane.b32.xlu0 %v881_v2, %s830_s15  ;;  %226 = vrot.lane.b32.xlu1 %v881_v2, %s831_s16 }
  0x14   : > { %v159_v7 = vcvt.s32.f32 %v158_v6 }
  0x16   : > { %v160_v8 = vsub.f32 1.0, %v159_v7 }
  0x17   : > { %281 = vrot.lane.b32.xlu1 %v881_v2, %s832_s17 }
  0x18   : > { %v896_v9 = vmul.f32 -10000.0, %v160_v8 }
  0x85   : > { %v166_v3 = vpop.permute.xlu0 %165  ;;  %v227_v16 = vpop.permute.xlu1 %226 }
  0x86   : > { %v172_v4 = vsel %vm167_vm1, %v166_v3, 0  ;;  %v233_v17 = vsel %vm231_vm2, %v227_v16, 0 }
  0x87   : > { %733 = vmatpush3.bf16.xpose.msra.mxu0 %v172_v4  ;;  %739 = vmatpush3.bf16.msra.mxu1 %v233_v17 }
  0x88   : > { %750 = vmatprep.subr.bf16.mxu0 %v828_v0  ;;  %744 = vmatprep.subr.bf16.mxu1 %v828_v0 }
  0x89   : > { %v282_v23 = vpop.permute.xlu1 %281 }
  0x8a   : > { %v287_v29 = vsel %vm167_vm1, %v282_v23, 0 }
  0x8e   : > { %735 = vmatmul.mubr.msk.bf16.vlgmr.msra.gmra.mrb[0].mxu0 %vm167_vm1, %v881_v2 }
  0x8f   : > { %752 = vmatprep.mubr.msk.bf16.mxu0 %vm829_vm0, %v828_v0 }
 0x161   : > { %v208_v10 = vpop.f32.mrb[0].mxu0 }
 0x162   : > { %v209_v11 = vadd.f32 %v208_v10, %v896_v9  ;;  %v736_v12 = vpop.f32.mrb[1].mxu0 }
 0x163   : > { %v211_v13 = vpop.f32.mrb[2].mxu0 }
 0x164   : > { %v737_v14 = vpop.f32.mrb[3].mxu0  ;;  %v214_v15 = vsel %vm167_vm1, %v209_v11, -inf }
 0x165   : > { %215 = vmax.xlane.f32.xlu0 %v214_v15 }
 0x17b   : > { %519 = vrot.lane.b32.xlu0 %v881_v2, %s833_s22 }
 0x1f2   : > { %v216_v18 = vpop.xlane.xlu0 %215 }
 0x1f3   : > { %v217_v19 = vsub.f32 %v209_v11, %v216_v18 }
 0x1f5   : > { %v218_v20 = vmul.f32 1.442695, %v217_v19 }
 0x1f6   : > { %v520_v32 = vpop.permute.xlu0 %519 }
 0x1f7   : > { %804 = vpow2.f32 %v218_v20  ;;  %v525_v34 = vsel %vm167_vm1, %v520_v32, 0 }
 0x201   : > { %v805_v21 = vpop.eup %804 }
 0x202   : > { %v220_v22 = vsel %vm167_vm1, %v805_v21, 0.0 }
 0x203   : > { %221 = vadd.xlane.f32.xlu1 %v220_v22 }
 0x214   : > { %279 = vrot.lane.b32.xlu1 %v881_v2, %s834_s23 }
 0x218   : > { %400 = vrot.lane.b32.xlu1 %v881_v2, %s835_s24 }
 0x21c   : > { %398 = vrot.lane.b32.xlu1 %v881_v2, %s836_s25 }
 0x220   : > { %517 = vrot.lane.b32.xlu1 %v881_v2, %s837_s26 }
 0x290   : > { %v222_v24 = vpop.xlane.xlu1 %221 }
 0x291   : > { %806 = vrcp.f32 %v222_v24 }
 0x294   : > { %v280_v27 = vpop.permute.xlu1 %279 }
 0x298   : > { %v401_v30 = vpop.permute.xlu1 %400 }
 0x299   : > { %v406_v31 = vsel %vm167_vm1, %v401_v30, 0 }
 0x29b   : > { %v807_v25 = vpop.eup %806 }
 0x29c   : > { %v224_v26 = vmul.f32 %v807_v25, %v805_v21  ;;  %v399_v33 = vpop.permute.xlu1 %398 }
 0x29e   : > { %v225_v28 = vpack.c.bf16 %v224_v26, %v224_v26 }
 0x2a0   : > { %741 = vmatmul.mubr.msk.bf16.vlgmr.msra.gmra.mrb[0].mxu1 %vm167_vm1, %v225_v28  ;;  %v518_v35 = vpop.permute.xlu1 %517 }
 0x2a1   : > { %745 = vmatpush3.bf16.xpose.msra.mxu1 %v287_v29  ;;  %746 = vmatprep.mubr.msk.bf16.mxu1 %vm829_vm0, %v828_v0 }
 0x2a2   : > { %756 = vmatprep.subr.bf16.mxu1 %v828_v0 }
 0x2a8   : > { %747 = vmatmul.mubr.msk.bf16.vlgmr.msra.gmra.mrb[4].mxu1 %vm167_vm1, %v280_v27 }
 0x2a9   : > { %757 = vmatpush3.bf16.xpose.msra.mxu1 %v406_v31  ;;  %758 = vmatprep.mubr.msk.bf16.mxu1 %vm829_vm0, %v828_v0 }
 0x2aa   : > { %768 = vmatprep.subr.bf16.mxu1 %v828_v0 }
 0x2b0   : > { %759 = vmatmul.mubr.msk.bf16.vlgmr.msra.gmra.mrb[8].mxu1 %vm167_vm1, %v399_v33 }
 0x2b1   : > { %769 = vmatpush3.bf16.xpose.msra.mxu1 %v525_v34  ;;  %770 = vmatprep.mubr.msk.bf16.mxu1 %vm829_vm0, %v828_v0 }
 0x2b8   : > { %771 = vmatmul.mubr.msk.bf16.vlgmr.msra.gmra.mrb[12].mxu1 %vm167_vm1, %v518_v35 }
 0x373   : > { %v269_v36 = vpop.f32.mrb[0].mxu1 }
 0x374   : > { %275 = vst.msk [vmem:[%s928_s29] sm:$0xff] %vm167_vm1, %v269_v36  ;;  %v742_v37 = vpop.f32.mrb[1].mxu1 }
 0x375   : > { %v272_v38 = vpop.f32.mrb[2].mxu1 }
 0x376   : > { %v743_v39 = vpop.f32.mrb[3].mxu1 }
 0x37b   : > { %v323_v40 = vpop.f32.mrb[4].mxu1 }
 0x37c   : > { %v324_v41 = vadd.f32 %v323_v40, %v896_v9  ;;  %v748_v42 = vpop.f32.mrb[5].mxu1 }
 0x37d   : > { %v326_v43 = vpop.f32.mrb[6].mxu1 }
 0x37e   : > { %v749_v44 = vpop.f32.mrb[7].mxu1  ;;  %v329_v45 = vsel %vm167_vm1, %v324_v41, -inf }
 0x37f   : > { %330 = vmax.xlane.f32.xlu1 %v329_v45 }
 0x383   : > { %v442_v46 = vpop.f32.mrb[8].mxu1 }
 0x384   : > { %v443_v47 = vadd.f32 %v442_v46, %v896_v9  ;;  %v760_v48 = vpop.f32.mrb[9].mxu1 }
 0x385   : > { %v445_v49 = vpop.f32.mrb[10].mxu1 }
 0x386   : > { %v448_v50 = vsel %vm167_vm1, %v443_v47, -inf  ;;  %v761_v51 = vpop.f32.mrb[11].mxu1 }
 0x387   : > { %449 = vmax.xlane.f32.xlu0 %v448_v50 }
 0x38b   : > { %v561_v52 = vpop.f32.mrb[12].mxu1 }
 0x38c   : > { %v562_v53 = vadd.f32 %v561_v52, %v896_v9  ;;  %v772_v54 = vpop.f32.mrb[13].mxu1 }
 0x38d   : > { %v564_v55 = vpop.f32.mrb[14].mxu1 }
 0x38e   : > { %v567_v56 = vsel %vm167_vm1, %v562_v53, -inf  ;;  %v773_v57 = vpop.f32.mrb[15].mxu1 }
 0x38f   : > { %568 = vmax.xlane.f32.xlu1 %v567_v56 }
 0x40c   : > { %v331_v58 = vpop.xlane.xlu1 %330 }
 0x40d   : > { %v332_v59 = vsub.f32 %v324_v41, %v331_v58 }
 0x40f   : > { %v333_v60 = vmul.f32 1.442695, %v332_v59 }
 0x411   : > { %808 = vpow2.f32 %v333_v60 }
 0x414   : > { %v450_v6 = vpop.xlane.xlu0 %449 }
 0x415   : > { %v451_v7 = vsub.f32 %v443_v47, %v450_v6 }
 0x417   : > { %v452_v8 = vmul.f32 1.442695, %v451_v7 }
 0x41b   : > { %v809_v61 = vpop.eup %808 }
 0x41c   : > { %v569_v62 = vpop.xlane.xlu1 %568  ;;  %v335_v63 = vsel %vm167_vm1, %v809_v61, 0.0 }
 0x41d   : > { %v570_v1 = vsub.f32 %v562_v53, %v569_v62  ;;  %336 = vadd.xlane.f32.xlu1 %v335_v63 }
 0x41f   : > { %v571_v3 = vmul.f32 1.442695, %v570_v1 }
 0x421   : > { %810 = vpow2.f32 %v571_v3 }
 0x422   : > { %812 = vpow2.f32 %v452_v8 }
 0x42b   : > { %v811_v4 = vpop.eup %810 }
 0x42c   : > { %v573_v5 = vsel %vm167_vm1, %v811_v4, 0.0  ;;  %v813_v9 = vpop.eup %812 }
 0x42d   : > { %574 = vadd.xlane.f32.xlu0 %v573_v5  ;;  %v454_v10 = vsel %vm167_vm1, %v813_v9, 0.0 }
 0x42e   : > { %341 = vrot.lane.b32.xlu1 %v881_v2, %s838_s30 }
 0x443   : > { %460 = vrot.lane.b32.xlu0 %v881_v2, %s839_s3 }
 0x452   : > { %455 = vadd.xlane.f32.xlu1 %v454_v10 }
 0x463   : > { %579 = vrot.lane.b32.xlu1 %v881_v2, %s840_s4 }
 0x4aa   : > { %v337_v11 = vpop.xlane.xlu1 %336 }
 0x4ab   : > { %814 = vrcp.f32 %v337_v11 }
 0x4ae   : > { %v342_v12 = vpop.permute.xlu1 %341 }
 0x4af   : > { %v347_v13 = vsel %vm231_vm2, %v342_v12, 0 }
 0x4b0   : > { %751 = vmatpush3.bf16.msra.mxu0 %v347_v13 }
 0x4b1   : > { %762 = vmatprep.subr.bf16.mxu0 %v828_v0 }
 0x4b5   : > { %v815_v14 = vpop.eup %814 }
 0x4b6   : > { %v339_v15 = vmul.f32 %v815_v14, %v809_v61 }
 0x4b8   : > { %v340_v16 = vpack.c.bf16 %v339_v15, %v339_v15 }
 0x4ba   : > { %753 = vmatmul.mubr.msk.bf16.vlgmr.msra.gmra.mrb[4].mxu0 %vm167_vm1, %v340_v16  ;;  %v575_v17 = vpop.xlane.xlu0 %574 }
 0x4bb   : > { %764 = vmatprep.mubr.msk.bf16.mxu0 %vm829_vm0, %v828_v0 }
 0x4be   : > { %v461_v18 = vpop.permute.xlu0 %460 }
 0x4bf   : > { %v466_v2 = vsel %vm231_vm2, %v461_v18, 0 }
 0x4c0   : > { %763 = vmatpush3.bf16.msra.mxu0 %v466_v2 }
 0x4c1   : > { %774 = vmatprep.subr.bf16.mxu0 %v828_v0 }
 0x4df   : > { %v456_v19 = vpop.xlane.xlu1 %455 }
 0x4e0   : > { %816 = vrcp.f32 %v456_v19 }
 0x4e1   : > { %818 = vrcp.f32 %v575_v17 }
 0x4e3   : > { %v580_v21 = vpop.permute.xlu1 %579 }
 0x4e4   : > { %v585_v23 = vsel %vm231_vm2, %v580_v21, 0 }
 0x4ea   : > { %v817_v20 = vpop.eup %816 }
 0x4eb   : > { %v458_v22 = vmul.f32 %v817_v20, %v813_v9  ;;  %v819_v25 = vpop.eup %818 }
 0x4ec   : > { %v577_v26 = vmul.f32 %v819_v25, %v811_v4 }
 0x4ed   : > { %v459_v24 = vpack.c.bf16 %v458_v22, %v458_v22 }
 0x4ee   : > { %v578_v27 = vpack.c.bf16 %v577_v26, %v577_v26 }
 0x4ef   : > { %765 = vmatmul.mubr.msk.bf16.vlgmr.msra.gmra.mrb[8].mxu0 %vm167_vm1, %v459_v24 }
 0x4f0   : > { %775 = vmatpush3.bf16.msra.mxu0 %v585_v23  ;;  %776 = vmatprep.mubr.msk.bf16.mxu0 %vm829_vm0, %v828_v0 }
 0x4f7   : > { %777 = vmatmul.mubr.msk.bf16.vlgmr.msra.gmra.mrb[12].mxu0 %vm167_vm1, %v578_v27 }
 0x58d   : > { %v383_v28 = vpop.f32.mrb[4].mxu0 }
 0x58e   : > { %390 = vrot.lane.b32.xlu1 %v383_v28, %s841_s5  ;;  %v754_v29 = vpop.f32.mrb[5].mxu0 }
 0x58f   : > { %v386_v30 = vpop.f32.mrb[6].mxu0 }
 0x590   : > { %v755_v31 = vpop.f32.mrb[7].mxu0 }
 0x5c2   : > { %v502_v32 = vpop.f32.mrb[8].mxu0 }
 0x5c3   : > { %509 = vrot.lane.b32.xlu0 %v502_v32, %s842_s6  ;;  %v766_v33 = vpop.f32.mrb[9].mxu0 }
 0x5c4   : > { %v505_v34 = vpop.f32.mrb[10].mxu0 }
 0x5c5   : > { %v767_v35 = vpop.f32.mrb[11].mxu0 }
 0x5ca   : > { %v621_v0 = vpop.f32.mrb[12].mxu0 }
 0x5cb   : > { %628 = vrot.lane.b32.xlu1 %v621_v0, %s843_s7  ;;  %v778_v36 = vpop.f32.mrb[13].mxu0 }
 0x5cc   : > { %v624_v37 = vpop.f32.mrb[14].mxu0 }
 0x5cd   : > { %v779_v38 = vpop.f32.mrb[15].mxu0 }
 0x600   : > { %v391_v39 = vpop.permute.xlu1 %390 }
 0x601   : > { %394 = vst.msk [vmem:[%s928_s29] sm:$0xff] %vm393_vm3, %v391_v39 }
 0x635   : > { %v510_v40 = vpop.permute.xlu0 %509 }
 0x636   : > { %513 = vst.msk [vmem:[%s928_s29] sm:$0xff] %vm512_vm4, %v510_v40 }
 0x63d   : > { %v629_v41 = vpop.permute.xlu1 %628 }
 0x63e   : > { %632 = vst.msk [vmem:[%s928_s29] sm:$0xff] %vm631_vm5, %v629_v41 }
 0x63f PF: > { %s12_s9 = sadd.s32 1, %s826_s9  }
 0x640   : > { %p9_p4 = scmp.ge.s32.totalorder %s12_s9, 4  }
 0x642   :  { %11 = sbr.rel (!%p9_p4) target bundleno = 1 (0x1), region = 61 }

// kernel: forward_transformer.37
= control target key start
LH: loop header
LB: loop body
LE: loop exit
PB: predicated region body
PF: predicated region fallthrough
CT: control target
= control target key end

     0   :  { %vm19_vm0 = vcmask 523264   ;;  %v132_v0 = vmov 0.0   ;;  %vm133_vm1 = vmmov 0   ;;  %vm43_vm2 = vcmask 261120   ;;  %s181_s1 = inlined_call_operand.vmem [shape: bf16[32,64], index: 1, kind: input, shape index: {}]   ;;  %s182_s0 = inlined_call_operand.vmem [shape: f32[16,32], index: 0, kind: input, shape index: {}]   ;;  %s183_s2 = inlined_call_operand.vmem [shape: f32[1,64], index: 2, kind: input, shape index: {}]   ;;  %s184_s3 = inlined_call_operand.vmem [shape: f32[16,64], index: 3, kind: output, shape index: {}]  }
   0x1   :  { %120 = vmatprep.subr.bf16.mxu0 %v132_v0  ;;  %v130_v1 = vld [vmem:[%s181_s1] sm:$0xff]   ;;  %124 = vmatprep.mubr.msk.bf16.mxu0 %vm133_vm1, %v132_v0  ;;  %20 = vst.msk [vmem:[#allocation2] sm:$0xff] %vm19_vm0, %v132_v0  ;;  %21 = vst.msk [vmem:[#allocation2 + $0x8] sm:$0xff] %vm19_vm0, %v132_v0  ;;  %v131_v2 = vld [vmem:[%s181_s1 + $0x8] sm:$0xff]  }
   0x2   :  { %121 = vmatpush3.bf16.msra.mxu0 %v130_v1  ;;  %v24_v3 = vld [vmem:[%s182_s0] sm:$0xff]  ;;  %v25_v4 = vld [vmem:[%s182_s0 + $0x8] sm:$0xff] }
   0x3   :  { %122 = vmatprep.subr.bf16.mxu0 %v132_v0  ;;  %v26_v5 = vpack.c.bf16 %v25_v4, %v24_v3  ;;  %v116_v14 = vld [vmem:[%s183_s2] ss:$0 sm:$0xff] }
   0x6   :  { %123 = vmatpush3.bf16.msra.mxu0 %v131_v2 }
   0x8   :  { %v22_v6 = vld [vmem:[#allocation2] sm:$0xff]  ;;  %v23_v8 = vld [vmem:[#allocation2 + $0x8] sm:$0xff] }
   0x9   :  { %125 = vmatmul.mubr.msk.bf16.vlgmr.msra.gmra.mrb[0].mxu0 %vm43_vm2, %v26_v5 }
  0xdc   :  { %v81_v7 = vpop.f32.mrb[0].mxu0 }
  0xdd   :  { %v88_v9 = vadd.f32 %v81_v7, %v22_v6  ;;  %v126_v10 = vpop.f32.mrb[1].mxu0 }
  0xde   :  { %v84_v11 = vpop.f32.mrb[2].mxu0 }
  0xdf   :  { %91 = vst.msk [vmem:[#allocation2] sm:$0xff] %vm19_vm0, %v88_v9  ;;  %v89_v12 = vadd.f32 %v84_v11, %v23_v8  ;;  %v127_v13 = vpop.f32.mrb[3].mxu0 }
  0xe1   :  { %92 = vst.msk [vmem:[#allocation2 + $0x8] sm:$0xff] %vm19_vm0, %v89_v12 }
  0xe6   :  { %v96_v15 = vld [vmem:[#allocation2] sm:$0xff] }
  0xe7   :  { %v105_v16 = vadd.f32 %v116_v14, %v96_v15 }
  0xe8   :  { %v97_v17 = vld [vmem:[#allocation2 + $0x8] sm:$0xff] }
  0xe9   :  { %107 = vst.msk [vmem:[%s184_s3] sm:$0xff] %vm19_vm0, %v105_v16  ;;  %v106_v18 = vadd.f32 %v116_v14, %v97_v17 }
  0xeb   :  { %108 = vst.msk [vmem:[%s184_s3 + $0x8] sm:$0xff] %vm19_vm0, %v106_v18 }

// kernel: forward_transformer.36
= control target key start
LH: loop header
LB: loop body
LE: loop exit
PB: predicated region body
PF: predicated region fallthrough
CT: control target
= control target key end

     0   :  { %vm19_vm0 = vcmask 261120   ;;  %v131_v0 = vmov 0.0   ;;  %vm132_vm1 = vmmov 0   ;;  %s181_s1 = inlined_call_operand.vmem [shape: bf16[32,32], index: 1, kind: input, shape index: {}]   ;;  %s182_s0 = inlined_call_operand.vmem [shape: f32[16,32], index: 0, kind: input, shape index: {}]   ;;  %s183_s2 = inlined_call_operand.vmem [shape: f32[1,32], index: 2, kind: input, shape index: {}]   ;;  %s184_s3 = inlined_call_operand.vmem [shape: f32[16,32], index: 3, kind: output, shape index: {}]  }
   0x1   :  { %119 = vmatprep.subr.bf16.mxu0 %v131_v0  ;;  %v129_v1 = vld [vmem:[%s181_s1] sm:$0xff]   ;;  %123 = vmatprep.mubr.msk.bf16.mxu0 %vm132_vm1, %v131_v0  ;;  %20 = vst.msk [vmem:[#allocation2] sm:$0xff] %vm19_vm0, %v131_v0  ;;  %21 = vst.msk [vmem:[#allocation2 + $0x8] sm:$0xff] %vm19_vm0, %v131_v0  ;;  %v130_v2 = vld [vmem:[%s181_s1 + $0x8] sm:$0xff]  }
   0x2   :  { %120 = vmatpush3.bf16.msra.mxu0 %v129_v1  ;;  %v24_v3 = vld [vmem:[%s182_s0] sm:$0xff]  ;;  %v25_v4 = vld [vmem:[%s182_s0 + $0x8] sm:$0xff] }
   0x3   :  { %121 = vmatprep.subr.bf16.mxu0 %v131_v0  ;;  %v26_v5 = vpack.c.bf16 %v25_v4, %v24_v3  ;;  %v115_v14 = vld [vmem:[%s183_s2] ss:$0 sm:$0xff] }
   0x6   :  { %122 = vmatpush3.bf16.msra.mxu0 %v130_v2 }
   0x8   :  { %v22_v6 = vld [vmem:[#allocation2] sm:$0xff]  ;;  %v23_v8 = vld [vmem:[#allocation2 + $0x8] sm:$0xff] }
   0x9   :  { %124 = vmatmul.mubr.msk.bf16.vlgmr.msra.gmra.mrb[0].mxu0 %vm19_vm0, %v26_v5 }
  0xdc   :  { %v81_v7 = vpop.f32.mrb[0].mxu0 }
  0xdd   :  { %v88_v9 = vadd.f32 %v81_v7, %v22_v6  ;;  %v125_v10 = vpop.f32.mrb[1].mxu0 }
  0xde   :  { %v84_v11 = vpop.f32.mrb[2].mxu0 }
  0xdf   :  { %90 = vst.msk [vmem:[#allocation2] sm:$0xff] %vm19_vm0, %v88_v9  ;;  %v89_v12 = vadd.f32 %v84_v11, %v23_v8  ;;  %v126_v13 = vpop.f32.mrb[3].mxu0 }
  0xe1   :  { %91 = vst.msk [vmem:[#allocation2 + $0x8] sm:$0xff] %vm19_vm0, %v89_v12 }
  0xe6   :  { %v95_v15 = vld [vmem:[#allocation2] sm:$0xff] }
  0xe7   :  { %v104_v16 = vadd.f32 %v115_v14, %v95_v15 }
  0xe8   :  { %v96_v17 = vld [vmem:[#allocation2 + $0x8] sm:$0xff] }
  0xe9   :  { %106 = vst.msk [vmem:[%s184_s3] sm:$0xff] %vm19_vm0, %v104_v16  ;;  %v105_v18 = vadd.f32 %v115_v14, %v96_v17 }
  0xeb   :  { %107 = vst.msk [vmem:[%s184_s3 + $0x8] sm:$0xff] %vm19_vm0, %v105_v18 }

// kernel: forward_transformer.49
= control target key start
LH: loop header
LB: loop body
LE: loop exit
PB: predicated region body
PF: predicated region fallthrough
CT: control target
= control target key end

     0   :  { %v159_v1 = vmov 0.0   ;;  %vm160_vm0 = vmmov 0   ;;  %vm17_vm1 = vcmask 130048   ;;  %s209_s0 = inlined_call_operand.vmem [shape: f32[16,32], index: 0, kind: input, shape index: {}]   ;;  %s210_s1 = inlined_call_operand.vmem [shape: bf16[32,16], index: 1, kind: input, shape index: {}]   ;;  %s211_s2 = inlined_call_operand.hbm [shape: f32[16,16], index: 2, kind: output, shape index: {}]  }
   0x1   :  { %v133_v0 = vld [vmem:[%s210_s1] sm:$0xff]   ;;  %120 = vmatprep.subr.bf16.mxu0 %v159_v1  ;;  %v134_v2 = vld [vmem:[%s210_s1 + $0x8] sm:$0xff]   ;;  %124 = vmatprep.mubr.msk.bf16.mxu0 %vm160_vm0, %v159_v1 }
   0x2   :  { %121 = vmatpush3.bf16.msra.mxu0 %v133_v0  ;;  %v22_v3 = vld [vmem:[%s209_s0] sm:$0xff]  ;;  %v23_v4 = vld [vmem:[%s209_s0 + $0x8] sm:$0xff] }
   0x3   :  { %7 = vsyncpa [#allocation4], 0  ;;  %122 = vmatprep.subr.bf16.mxu0 %v159_v1  ;;  %18 = vst.msk [vmem:[#allocation2] sm:$0xff] %vm17_vm1, %v159_v1  ;;  %v24_v5 = vpack.c.bf16 %v23_v4, %v22_v3  ;;  %vm41_vm2 = vcmask 261120   ;;  %s161_s0 = smov [#allocation3]  }
   0x4   :  { %19 = vst.msk [vmem:[#allocation2 + $0x8] sm:$0xff] %vm17_vm1, %v159_v1  ;;  %s103_s1 = sshll.u32 %s161_s0, 4  ;;  %s104_s1 = int_to_ptr.vmem [resolvable:$true] %s103_s1 }
   0x5   :  { %s135_s17 = scalar_lea.vmem %s104_s1, 256  ;;  %p140_p1 = scmp.lt.s32.totalorder %s104_s1, %s104_s1 }
   0x6   :  { %123 = vmatpush3.bf16.msra.mxu0 %v134_v2  ;;  %p136_p0 = scmp.ne.s32.totalorder %s104_s1, %s135_s17  ;;  %p141_p2 = scmp.lt.s32.totalorder %s135_s17, %s135_s17 }
   0x8   :  { %p142_p3 = por %p141_p2, %p140_p1 }
   0x9   :  { %125 = vmatmul.mubr.msk.bf16.vlgmr.msra.gmra.mrb[0].mxu0 %vm41_vm2, %v24_v5 }
   0xa   :  { %v20_v6 = vld [vmem:[#allocation2] sm:$0xff]  ;;  %p143_p4 = pnand %p142_p3, %p136_p0 }
   0xb   :  { %v21_v8 = vld [vmem:[#allocation2 + $0x8] sm:$0xff] }
  0xdc   :  { %v79_v7 = vpop.f32.mrb[0].mxu0 }
  0xdd   :  { %v86_v9 = vadd.f32 %v79_v7, %v20_v6  ;;  %v126_v10 = vpop.f32.mrb[1].mxu0 }
  0xde   :  { %v82_v11 = vpop.f32.mrb[2].mxu0 }
  0xdf   :  { %89 = vst.msk [vmem:[#allocation2] sm:$0xff] %vm17_vm1, %v86_v9  ;;  %v87_v12 = vadd.f32 %v82_v11, %v21_v8  ;;  %v127_v13 = vpop.f32.mrb[3].mxu0 }
  0xe1   :  { %90 = vst.msk [vmem:[#allocation2 + $0x8] sm:$0xff] %vm17_vm1, %v87_v12 }
  0xe6   :  { %v94_v14 = vld [vmem:[#allocation2] sm:$0xff] }
  0xe7   :  { %96 = vst.msk [vmem:[#allocation3] sm:$0xff] %vm17_vm1, %v94_v14 }
  0xe8   :  { %v95_v15 = vld [vmem:[#allocation2 + $0x8] sm:$0xff] }
  0xe9   :  { %97 = vst.msk [vmem:[#allocation3 + $0x8] sm:$0xff] %vm17_vm1, %v95_v15 }
  0xea   :  { %146 = shalt.err (!%p143_p4)
}
  0xeb   :  { %s147_s20 = scalar_lea.hbm %s211_s2, 256 }
  0xec   :  { %p148_p5 = scmp.ne.s32.totalorder %s211_s2, %s147_s20  ;;  %p151_p6 = scmp.lt.u32.totalorder %s147_s20, %s211_s2 }
  0xee   :  { %p153_p7 = pnand %p151_p6, %p148_p5 }
  0xf0   :  { %156 = shalt.err (!%p153_p7)
}
  0xf1   :  { %s162_s25 = smov 128   ;;  %s163_s26 = smov 8  }
  0xf2   :  { %109 = dma.vmem_to_hbm [thread:$0]  %s104_s1, 256, %s211_s2, [#allocation4], %s162_s25, %s162_s25, %s163_s26  }
  0xf3   :  { %157 = dma.done.wait [#allocation4], 256  }
  0xf4   :  { %158 = vsyncadd [#allocation4], 4294967040 }
  0xf5   :  { %113 = vsyncpa [#allocation4], 1 }

// kernel: forward_transformer.38
= control target key start
LH: loop header
LB: loop body
LE: loop exit
PB: predicated region body
PF: predicated region fallthrough
CT: control target
= control target key end

     0   :  { %s922_s12 = smov 0   ;;  %s1021_s0 = inlined_call_operand.vmem [shape: f32[2,8,32], index: 0, kind: input, shape index: {}]   ;;  %s1022_s1 = inlined_call_operand.vmem [shape: f32[2,8,64], index: 1, kind: input, shape index: {}]   ;;  %s1023_s2 = inlined_call_operand.vmem [shape: s8[2,8,8], index: 2, kind: input, shape index: {}]   ;;  %s1024_s3 = inlined_call_operand.vmem [shape: f32[2,8,32], index: 3, kind: output, shape index: {}]  }
   0x1 LB: > { %s763_s13 = sadd.s32 4294967295, %s888_s12   ;;  %p767_p0 = scmp.ge.s32.totalorder %s888_s12, 1  ;;  %s888_s12 = sphi %s922_s12, %s13_s12  }
   0x2   : > { %p154_p1 = scmp.lt.s32.totalorder %s888_s12, 3 }
   0x4   : > { %p155_p2 = pnand %p767_p0, %p154_p1 }
   0x5   : > { %p184_p3 = scmp.lt.s32.totalorder (!%p155_p2), %s763_s13, 1  ;;  %v890_v0 = vmov (!%p155_p2), 0.0   ;;  %vm891_vm0 = vmmov (!%p155_p2), 0   ;;  %vm210_vm1 = vcmask (!%p155_p2), 64512   ;;  %s892_s25 = smov (!%p155_p2), 96   ;;  %vm275_vm2 = vcmask (!%p155_p2), 1043456  }
   0x6   : > { %158 = sbr.rel (%p155_p2) target bundleno = 1440 (0x5a0), region = 32  ;;  %798 = vmatprep.subr.bf16.mxu0 (!%p155_p2), %v890_v0  ;;  %800 = vmatprep.mubr.msk.bf16.mxu0 (!%p155_p2), %vm891_vm0, %v890_v0  ;;  %s893_s26 = smov (!%p155_p2), 120   ;;  %vm440_vm3 = vcmask (!%p155_p2), 130112   ;;  %vm562_vm4 = vcmask (!%p155_p2), 195712   ;;  %vm684_vm5 = vcmask (!%p155_p2), 261312  }
   0x7   : > { %804 = vmatprep.subr.bf16.mxu1 (!%p155_p2), %v890_v0  ;;  %806 = vmatprep.mubr.msk.bf16.mxu1 (!%p155_p2), %vm891_vm0, %v890_v0  ;;  %s894_s27 = smov (!%p155_p2), 112   ;;  %s895_s28 = smov (!%p155_p2), 104  }
   0x8   : > { %s896_s5 = smov (!%p155_p2), 88   ;;  %s897_s6 = smov (!%p155_p2), 72  }
   0x9   : > { %s898_s7 = smov (!%p155_p2), 80   ;;  %s899_s8 = smov (!%p155_p2), 8  }
   0xa   : > { %s900_s9 = smov (!%p155_p2), 16   ;;  %s901_s10 = smov (!%p155_p2), 24  }
   0xd   : > { %s1026_s13 = smov (!%p184_p3, %s763_s13), 1 }
   0xe   : > { %s936_s14 = sshll.u32 %s1026_s13, 3  ;;  %s770_s21 = sshll.u32 %s1026_s13, 1 }
   0xf   : > { %s191_s17 = scalar_lea.vmem %s1022_s1, %s936_s14  ;;  %s187_s20 = scalar_lea.vmem %s1021_s0, %s936_s14 }
  0x10   : > { %v208_v1 = vld [vmem:[%s191_s17] sm:$0xff]  ;;  %s195_s24 = scalar_lea.vmem %s1023_s2, %s770_s21  ;;  %s987_s4 = scalar_lea.vmem %s1024_s3, %s936_s14 }
  0x11   : > { %v946_v2 = vpack.c.bf16 %v208_v1, %v208_v1  ;;  %v206_v4 = vld [vmem:[%s187_s20] sm:$0xff] }
  0x12   : > { %v207_v5 = vpack.c.bf16 %v206_v4, %v206_v4  ;;  %v201_v6 = vld [vmem:[%s195_s24] sm:$0x3] }
  0x13   : > { %v215_v3 = vsel %vm210_vm1, %v946_v2, 0  ;;  %v202_v7 = vunpack.c.0.s8 %v201_v6  ;;  %270 = vrot.lane.b32.xlu1 %v946_v2, %s892_s25 }
  0x14   : > { %799 = vmatpush3.bf16.xpose.msra.mxu0 %v215_v3 }
  0x15   : > { %816 = vmatprep.subr.bf16.mxu0 %v890_v0  ;;  %v203_v8 = vcvt.s32.f32 %v202_v7 }
  0x17   : > { %v204_v9 = vsub.f32 1.0, %v203_v8  ;;  %328 = vrot.lane.b32.xlu1 %v946_v2, %s893_s26 }
  0x19   : > { %v957_v10 = vmul.f32 -10000.0, %v204_v9 }
  0x1b   : > { %801 = vmatmul.mubr.msk.bf16.vlgmr.msra.gmra.mrb[0].mxu0 %vm210_vm1, %v207_v5  ;;  %450 = vrot.lane.b32.xlu1 %v946_v2, %s894_s27 }
  0x1c   : > { %818 = vmatprep.mubr.msk.bf16.mxu0 %vm891_vm0, %v890_v0 }
  0x1f   : > { %447 = vrot.lane.b32.xlu1 %v207_v5, %s894_s27 }
  0x23   : > { %572 = vrot.lane.b32.xlu1 %v946_v2, %s895_s28 }
  0x27   : > { %569 = vrot.lane.b32.xlu1 %v207_v5, %s895_s28 }
  0x85   : > { %v271_v22 = vpop.permute.xlu1 %270 }
  0x86   : > { %v277_v23 = vsel %vm275_vm2, %v271_v22, 0 }
  0x87   : > { %805 = vmatpush3.bf16.msra.mxu1 %v277_v23 }
  0x88   : > { %810 = vmatprep.subr.bf16.mxu1 %v890_v0 }
  0x89   : > { %v329_v26 = vpop.permute.xlu1 %328 }
  0x8a   : > { %v334_v28 = vsel %vm210_vm1, %v329_v26, 0 }
  0x8d   : > { %v451_v30 = vpop.permute.xlu1 %450 }
  0x8e   : > { %v456_v33 = vsel %vm210_vm1, %v451_v30, 0 }
  0x91   : > { %v448_v32 = vpop.permute.xlu1 %447 }
  0x95   : > { %v573_v34 = vpop.permute.xlu1 %572 }
  0x96   : > { %v578_v35 = vsel %vm210_vm1, %v573_v34, 0 }
  0x99   : > { %v570_v36 = vpop.permute.xlu1 %569 }
  0xee   : > { %v251_v11 = vpop.f32.mrb[0].mxu0 }
  0xef   : > { %v252_v12 = vadd.f32 %v251_v11, %v957_v10  ;;  %v802_v13 = vpop.f32.mrb[1].mxu0 }
  0xf0   : > { %v254_v14 = vpop.f32.mrb[2].mxu0 }
  0xf1   : > { %v803_v15 = vpop.f32.mrb[3].mxu0  ;;  %v257_v16 = vsel %vm210_vm1, %v252_v12, -inf }
  0xf2   : > { %258 = vmax.xlane.f32.xlu0 %v257_v16 }
 0x17f   : > { %v259_v17 = vpop.xlane.xlu0 %258 }
 0x180   : > { %v260_v18 = vsub.f32 %v252_v12, %v259_v17 }
 0x182   : > { %v261_v19 = vmul.f32 1.442695, %v260_v18 }
 0x184   : > { %866 = vpow2.f32 %v261_v19 }
 0x18e   : > { %v867_v20 = vpop.eup %866 }
 0x18f   : > { %v263_v21 = vsel %vm210_vm1, %v867_v20, 0.0 }
 0x190   : > { %264 = vadd.xlane.f32.xlu0 %v263_v21 }
 0x1a6   : > { %325 = vrot.lane.b32.xlu0 %v207_v5, %s893_s26 }
 0x21d   : > { %v265_v24 = vpop.xlane.xlu0 %264 }
 0x21e   : > { %868 = vrcp.f32 %v265_v24 }
 0x221   : > { %v326_v31 = vpop.permute.xlu0 %325 }
 0x228   : > { %v869_v25 = vpop.eup %868 }
 0x229   : > { %v267_v27 = vmul.f32 %v869_v25, %v867_v20 }
 0x22b   : > { %v268_v29 = vpack.c.bf16 %v267_v27, %v267_v27 }
 0x22d   : > { %807 = vmatmul.mubr.msk.bf16.vlgmr.msra.gmra.mrb[0].mxu1 %vm210_vm1, %v268_v29 }
 0x22e   : > { %811 = vmatpush3.bf16.xpose.msra.mxu1 %v334_v28  ;;  %812 = vmatprep.mubr.msk.bf16.mxu1 %vm891_vm0, %v890_v0 }
 0x22f   : > { %822 = vmatprep.subr.bf16.mxu1 %v890_v0 }
 0x235   : > { %813 = vmatmul.mubr.msk.bf16.vlgmr.msra.gmra.mrb[4].mxu1 %vm210_vm1, %v326_v31 }
 0x236   : > { %823 = vmatpush3.bf16.xpose.msra.mxu1 %v456_v33  ;;  %824 = vmatprep.mubr.msk.bf16.mxu1 %vm891_vm0, %v890_v0 }
 0x237   : > { %834 = vmatprep.subr.bf16.mxu1 %v890_v0 }
 0x23d   : > { %825 = vmatmul.mubr.msk.bf16.vlgmr.msra.gmra.mrb[8].mxu1 %vm210_vm1, %v448_v32 }
 0x23e   : > { %835 = vmatpush3.bf16.xpose.msra.mxu1 %v578_v35  ;;  %836 = vmatprep.mubr.msk.bf16.mxu1 %vm891_vm0, %v890_v0 }
 0x245   : > { %837 = vmatmul.mubr.msk.bf16.vlgmr.msra.gmra.mrb[12].mxu1 %vm210_vm1, %v570_v36 }
 0x300   : > { %v313_v37 = vpop.f32.mrb[0].mxu1 }
 0x301   : > { %319 = vst.msk [vmem:[%s987_s4] sm:$0xff] %vm210_vm1, %v313_v37  ;;  %v808_v38 = vpop.f32.mrb[1].mxu1 }
 0x302   : > { %v316_v39 = vpop.f32.mrb[2].mxu1 }
 0x303   : > { %v809_v40 = vpop.f32.mrb[3].mxu1 }
 0x308   : > { %v370_v41 = vpop.f32.mrb[4].mxu1 }
 0x309   : > { %v371_v42 = vadd.f32 %v370_v41, %v957_v10  ;;  %v814_v43 = vpop.f32.mrb[5].mxu1 }
 0x30a   : > { %v373_v44 = vpop.f32.mrb[6].mxu1 }
 0x30b   : > { %v815_v45 = vpop.f32.mrb[7].mxu1  ;;  %v376_v46 = vsel %vm210_vm1, %v371_v42, -inf }
 0x30c   : > { %377 = vmax.xlane.f32.xlu1 %v376_v46 }
 0x310   : > { %v492_v47 = vpop.f32.mrb[8].mxu1 }
 0x311   : > { %v493_v48 = vadd.f32 %v492_v47, %v957_v10  ;;  %v826_v49 = vpop.f32.mrb[9].mxu1 }
 0x312   : > { %v495_v50 = vpop.f32.mrb[10].mxu1 }
 0x313   : > { %v827_v51 = vpop.f32.mrb[11].mxu1  ;;  %v498_v52 = vsel %vm210_vm1, %v493_v48, -inf }
 0x314   : > { %499 = vmax.xlane.f32.xlu0 %v498_v52 }
 0x318   : > { %v614_v53 = vpop.f32.mrb[12].mxu1 }
 0x319   : > { %v615_v54 = vadd.f32 %v614_v53, %v957_v10  ;;  %v838_v55 = vpop.f32.mrb[13].mxu1 }
 0x31a   : > { %v617_v56 = vpop.f32.mrb[14].mxu1 }
 0x31b   : > { %v839_v57 = vpop.f32.mrb[15].mxu1  ;;  %v620_v58 = vsel %vm210_vm1, %v615_v54, -inf }
 0x31c   : > { %621 = vmax.xlane.f32.xlu1 %v620_v58 }
 0x32d   : > { %388 = vrot.lane.b32.xlu1 %v946_v2, %s896_s5 }
 0x399   : > { %v378_v59 = vpop.xlane.xlu1 %377 }
 0x39a   : > { %v379_v60 = vsub.f32 %v371_v42, %v378_v59 }
 0x39c   : > { %v380_v61 = vmul.f32 1.442695, %v379_v60 }
 0x39e   : > { %870 = vpow2.f32 %v380_v61 }
 0x3a1   : > { %v500_v62 = vpop.xlane.xlu0 %499 }
 0x3a2   : > { %v501_v63 = vsub.f32 %v493_v48, %v500_v62 }
 0x3a4   : > { %v502_v1 = vmul.f32 1.442695, %v501_v63 }
 0x3a6   : > { %872 = vpow2.f32 %v502_v1 }
 0x3a8   : > { %v871_v3 = vpop.eup %870 }
 0x3a9   : > { %v622_v4 = vpop.xlane.xlu1 %621  ;;  %v382_v5 = vsel %vm210_vm1, %v871_v3, 0.0 }
 0x3aa   : > { %v623_v6 = vsub.f32 %v615_v54, %v622_v4  ;;  %383 = vadd.xlane.f32.xlu0 %v382_v5 }
 0x3ac   : > { %v624_v7 = vmul.f32 1.442695, %v623_v6 }
 0x3ad   : > { %v389_v8 = vpop.permute.xlu1 %388 }
 0x3ae   : > { %874 = vpow2.f32 %v624_v7  ;;  %v394_v9 = vsel %vm275_vm2, %v389_v8, 0 }
 0x3af   : > { %817 = vmatpush3.bf16.msra.mxu0 %v394_v9 }
 0x3b0   : > { %v873_v10 = vpop.eup %872  ;;  %828 = vmatprep.subr.bf16.mxu0 %v890_v0 }
 0x3b1   : > { %v504_v11 = vsel %vm210_vm1, %v873_v10, 0.0 }
 0x3b2   : > { %505 = vadd.xlane.f32.xlu1 %v504_v11 }
 0x3b8   : > { %v875_v12 = vpop.eup %874 }
 0x3b9   : > { %v626_v13 = vsel %vm210_vm1, %v875_v12, 0.0 }
 0x3ba   : > { %627 = vadd.xlane.f32.xlu0 %v626_v13 }
 0x3c3   : > { %632 = vrot.lane.b32.xlu1 %v946_v2, %s897_s6 }
 0x3d0   : > { %510 = vrot.lane.b32.xlu0 %v946_v2, %s898_s7 }
 0x437   : > { %v384_v14 = vpop.xlane.xlu0 %383 }
 0x438   : > { %876 = vrcp.f32 %v384_v14 }
 0x43f   : > { %v506_v15 = vpop.xlane.xlu1 %505 }
 0x440   : > { %878 = vrcp.f32 %v506_v15 }
 0x442   : > { %v877_v16 = vpop.eup %876 }
 0x443   : > { %v386_v17 = vmul.f32 %v877_v16, %v871_v3  ;;  %v633_v23 = vpop.permute.xlu1 %632 }
 0x444   : > { %v638_v25 = vsel %vm275_vm2, %v633_v23, 0 }
 0x445   : > { %v387_v18 = vpack.c.bf16 %v386_v17, %v386_v17 }
 0x447   : > { %v628_v19 = vpop.xlane.xlu0 %627  ;;  %819 = vmatmul.mubr.msk.bf16.vlgmr.msra.gmra.mrb[4].mxu0 %vm210_vm1, %v387_v18 }
 0x448   : > { %880 = vrcp.f32 %v628_v19  ;;  %830 = vmatprep.mubr.msk.bf16.mxu0 %vm891_vm0, %v890_v0 }
 0x44a   : > { %v879_v20 = vpop.eup %878 }
 0x44b   : > { %v508_v21 = vmul.f32 %v879_v20, %v873_v10  ;;  %v511_v22 = vpop.permute.xlu0 %510 }
 0x44c   : > { %v516_v2 = vsel %vm275_vm2, %v511_v22, 0 }
 0x44d   : > { %829 = vmatpush3.bf16.msra.mxu0 %v516_v2  ;;  %v509_v24 = vpack.c.bf16 %v508_v21, %v508_v21 }
 0x44e   : > { %840 = vmatprep.subr.bf16.mxu0 %v890_v0 }
 0x450   : > { %831 = vmatmul.mubr.msk.bf16.vlgmr.msra.gmra.mrb[8].mxu0 %vm210_vm1, %v509_v24 }
 0x451   : > { %841 = vmatpush3.bf16.msra.mxu0 %v638_v25  ;;  %842 = vmatprep.mubr.msk.bf16.mxu0 %vm891_vm0, %v890_v0 }
 0x452   : > { %v881_v26 = vpop.eup %880 }
 0x453   : > { %v630_v27 = vmul.f32 %v881_v26, %v875_v12 }
 0x455   : > { %v631_v28 = vpack.c.bf16 %v630_v27, %v630_v27 }
 0x458   : > { %843 = vmatmul.mubr.msk.bf16.vlgmr.msra.gmra.mrb[12].mxu0 %vm210_vm1, %v631_v28 }
 0x51a   : > { %v430_v29 = vpop.f32.mrb[4].mxu0 }
 0x51b   : > { %437 = vrot.lane.b32.xlu1 %v430_v29, %s899_s8  ;;  %v820_v30 = vpop.f32.mrb[5].mxu0 }
 0x51c   : > { %v433_v31 = vpop.f32.mrb[6].mxu0 }
 0x51d   : > { %v821_v32 = vpop.f32.mrb[7].mxu0 }
 0x523   : > { %v552_v33 = vpop.f32.mrb[8].mxu0 }
 0x524   : > { %559 = vrot.lane.b32.xlu0 %v552_v33, %s900_s9  ;;  %v832_v34 = vpop.f32.mrb[9].mxu0 }
 0x525   : > { %v555_v35 = vpop.f32.mrb[10].mxu0 }
 0x526   : > { %v833_v0 = vpop.f32.mrb[11].mxu0 }
 0x52b   : > { %v674_v36 = vpop.f32.mrb[12].mxu0 }
 0x52c   : > { %681 = vrot.lane.b32.xlu1 %v674_v36, %s901_s10  ;;  %v844_v37 = vpop.f32.mrb[13].mxu0 }
 0x52d   : > { %v677_v38 = vpop.f32.mrb[14].mxu0 }
 0x52e   : > { %v845_v39 = vpop.f32.mrb[15].mxu0 }
 0x58d   : > { %v438_v40 = vpop.permute.xlu1 %437 }
 0x58e   : > { %441 = vst.msk [vmem:[%s987_s4] sm:$0xff] %vm440_vm3, %v438_v40 }
 0x596   : > { %v560_v41 = vpop.permute.xlu0 %559 }
 0x597   : > { %563 = vst.msk [vmem:[%s987_s4] sm:$0xff] %vm562_vm4, %v560_v41 }
 0x59e   : > { %v682_v42 = vpop.permute.xlu1 %681 }
 0x59f   : > { %685 = vst.msk [vmem:[%s987_s4] sm:$0xff] %vm684_vm5, %v682_v42 }
 0x5a0 PF: > { %s13_s12 = sadd.s32 1, %s888_s12  }
 0x5a1   : > { %p10_p4 = scmp.ge.s32.totalorder %s13_s12, 4  }
 0x5a3   :  { %12 = sbr.rel (!%p10_p4) target bundleno = 1 (0x1), region = 68 }

</bundles_post_ra>
